<compile_context>
chip_gen: v5e
topology: v5e:2x2
jax: 0.10.0
libtpu: 0.0.40
codegen_flags: <defaults>
</compile_context>

<pallas_src>
import functools

import jax
import jax.numpy as jnp
from jax import lax
from jax.experimental import pallas as pl
from jax.experimental.pallas import tpu as pltpu


def clstm_kernel(x_ref, w_ref, vec_ref, c_ref, h_out_ref, c_out_ref,
                 *, ks, th, width, cf):
    """One (batch, row-tile) grid step of the ConvLSTM cell.

    x_ref   : (Hp, Wp, Ct)      bf16, padded [input ; hidden] for this batch elem (NHWC)
    w_ref   : (ks*ks, Ct, 4*Cf) bf16, per-tap conv weights (i|f|o columns pre-scaled by 0.5)
    vec_ref : (3, 4*Cf)         f32, rows = [bias_pre, post_scale, post_bias]
    c_ref   : (Cf, th*W)        previous cell state, channels-major (lane-dense)
    outs    : (Cf, th*W)        next_h, next_c row tiles (lane-dense, unmasked stores)
    """
    ct = x_ref.shape[-1]
    m = th * width
    cf4 = 4 * cf

    t = pl.program_id(1)
    row0 = pl.multiple_of(t * th, th)

    # ---- kx (sublane-axis) shifts hoisted: ks bands of th+ks-1 rows each ----
    bands = [x_ref[pl.ds(row0, th + ks - 1), kx:kx + width, :] for kx in range(ks)]

    # ---- accumulating per-tap MXU dots (K = Ct each); no im2col concat ----
    acc = jnp.zeros((m, cf4), jnp.float32)
    for ky in range(ks):
        for kx in range(ks):
            patch = bands[kx][ky:ky + th].reshape(m, ct)     # leading-dim slice: cheap
            acc = acc + jnp.dot(patch, w_ref[ky * ks + kx],
                                preferred_element_type=jnp.float32)

    # ---- gates: one tanh pass + scale/shift; sigmoid(a) = 0.5*tanh(0.5*a)+0.5,
    #      with the 0.5 pre-scale folded into the weights/bias in the wrapper ----
    bias_pre = vec_ref[0:1, :]
    post_scale = vec_ref[1:2, :]
    post_bias = vec_ref[2:3, :]
    gates = jnp.tanh(acc + bias_pre) * post_scale + post_bias    # (m, 4*Cf)

    # ---- single transpose -> channels-major; everything downstream lane-dense ----
    g_t = gates.T                                                # (4*Cf, m)
    i_g = g_t[0 * cf:1 * cf, :]
    f_g = g_t[1 * cf:2 * cf, :]
    o_g = g_t[2 * cf:3 * cf, :]
    g_g = g_t[3 * cf:4 * cf, :]

    c_prev = c_ref[...].astype(jnp.float32)                      # (Cf, m)
    next_c = f_g * c_prev + i_g * g_g
    next_h = o_g * jnp.tanh(next_c)

    c_out_ref[...] = next_c.astype(c_out_ref.dtype)
    h_out_ref[...] = next_h.astype(h_out_ref.dtype)


def clstm_cell_forward(x, hidden_state, weight, bias, filter_size):
    """Pallas-backed equivalent of CLSTM_cell.forward.

    x      : (B, Cin, H, W)         NCHW, matches the PyTorch module
    hidden : ((B, Cf, H, W), (B, Cf, H, W))
    weight : (4*Cf, Cin+Cf, ks, ks) OIHW, matches nn.Conv2d
    bias   : (4*Cf,)
    returns (next_h, next_c) in NCHW
    """
    h, c = hidden_state
    pad = (filter_size - 1) // 2
    B, Cin, H, W = x.shape
    Cf = h.shape[1]
    Ct = Cin + Cf
    ks = filter_size
    Cf4 = 4 * Cf
    Hp, Wp = H + 2 * pad, W + 2 * pad

    # Adaptive row tile: whole image for small frames, otherwise the largest
    # divisor of H with th*W <= M_CAP and th*W a multiple of 128 (lane-dense
    # c/h blocks need a 128-aligned last block dim when not full-extent).
    M_CAP = 2048
    if H * W <= M_CAP:
        th = H
    else:
        cands = [d for d in range(1, H) if H % d == 0
                 and d * W <= M_CAP and (d * W) % 128 == 0]
        th = max(cands) if cands else H
    n_row_tiles = H // th
    m_tile = th * W

    # ---- interface glue, hoisted out of the kernel hot path ----
    combined = jnp.concatenate([x, h], axis=1)                    # (B, Ct, H, W)
    comb_nhwc = jnp.transpose(combined, (0, 2, 3, 1))             # (B, H, W, Ct)
    comb_pad = jnp.pad(comb_nhwc, ((0, 0), (pad, pad), (pad, pad), (0, 0)))
    comb_pad = comb_pad.astype(jnp.bfloat16)                      # bf16 MXU operand
    c_cm = c.reshape(B, Cf, H * W)                                # channels-major (free)

    # Per-tap weight slabs (ks*ks, Ct, 4*Cf); sigmoid gate columns pre-scaled
    # by 0.5 so the in-kernel nonlinearity is a plain tanh + scale/shift.
    pre_scale = jnp.concatenate([jnp.full((3 * Cf,), 0.5, jnp.float32),
                                 jnp.ones((Cf,), jnp.float32)])
    w_taps = jnp.transpose(weight, (2, 3, 1, 0)).reshape(ks * ks, Ct, Cf4)
    w_taps = (w_taps * pre_scale).astype(jnp.bfloat16)
    bias_pre = bias.astype(jnp.float32) * pre_scale
    post_scale = pre_scale                                        # [0.5]*3Cf + [1.0]*Cf
    post_bias = jnp.concatenate([jnp.full((3 * Cf,), 0.5, jnp.float32),
                                 jnp.zeros((Cf,), jnp.float32)])
    gate_vecs = jnp.stack([bias_pre, post_scale, post_bias])      # (3, 4*Cf) f32

    kernel = functools.partial(clstm_kernel, ks=ks, th=th, width=W, cf=Cf)

    out_shape = (jax.ShapeDtypeStruct((B, Cf, H * W), x.dtype),
                 jax.ShapeDtypeStruct((B, Cf, H * W), x.dtype))

    grid_spec = pltpu.PrefetchScalarGridSpec(
        num_scalar_prefetch=0,
        grid=(B, n_row_tiles),
        in_specs=[
            # Whole padded image per batch element; index_map constant along
            # the row-tile axis -> DMA'd once per batch element, VMEM-resident.
            pl.BlockSpec((None, Hp, Wp, Ct), lambda b, t: (b, 0, 0, 0)),
            # Weights / gate vectors: resident across the whole grid.
            pl.BlockSpec((ks * ks, Ct, Cf4), lambda b, t: (0, 0, 0)),
            pl.BlockSpec((3, Cf4), lambda b, t: (0, 0)),
            # Previous cell state, channels-major: one lane-dense row tile per step.
            pl.BlockSpec((None, Cf, m_tile), lambda b, t: (b, 0, t)),
        ],
        out_specs=(
            pl.BlockSpec((None, Cf, m_tile), lambda b, t: (b, 0, t)),
            pl.BlockSpec((None, Cf, m_tile), lambda b, t: (b, 0, t)),
        ),
    )

    # VMEM budget derived from actual block sizes (double-buffered pipeline
    # blocks + in-kernel f32 temporaries), capped at v7x's 64 MiB physical.
    blk_bytes = (Hp * Wp * Ct * 2 + ks * ks * Ct * Cf4 * 2 + 3 * Cf4 * 4
                 + 3 * Cf * m_tile * 4)
    tmp_bytes = 4 * m_tile * Cf4 * 4 + ks * (th + ks - 1) * W * Ct * 2
    vmem_limit = int(min(max(2 * (2 * blk_bytes + tmp_bytes), 32 * 1024 * 1024),
                         64 * 1024 * 1024))

    h_out, c_out = pl.pallas_call(
        kernel,
        out_shape=out_shape,
        grid_spec=grid_spec,
        compiler_params=pltpu.CompilerParams(
            dimension_semantics=("parallel", "arbitrary"),
            vmem_limit_bytes=vmem_limit,
        ),
    )(comb_pad, w_taps, gate_vecs, c_cm)

    # Outputs are already channels-major -> pure reshape back to NCHW (free).
    return (h_out.reshape(B, Cf, H, W), c_out.reshape(B, Cf, H, W))


def _reference_forward(x, hidden_state, weight, bias, filter_size):
    """Pure-JAX f32 reference mirroring the PyTorch module exactly (NCHW)."""
    h, c = hidden_state
    pad = (filter_size - 1) // 2
    combined = jnp.concatenate([x, h], axis=1)
    A = lax.conv_general_dilated(
        combined, weight, window_strides=(1, 1),
        padding=[(pad, pad), (pad, pad)],
        dimension_numbers=("NCHW", "OIHW", "NCHW"),
    ) + bias.reshape(1, -1, 1, 1)
    ai, af, ao, ag = jnp.split(A, 4, axis=1)
    i = jax.nn.sigmoid(ai)
    f = jax.nn.sigmoid(af)
    o = jax.nn.sigmoid(ao)
    g = jnp.tanh(ag)
    next_c = f * c + i * g
    next_h = o * jnp.tanh(next_c)
    return next_h, next_c


if __name__ == "__main__":
    # Module config (small, consistent with CLSTM_cell).
    batch = 2
    input_chans = 4
    num_features = 32
    filter_size = 3
    H = W = 16

    key = jax.random.PRNGKey(0)
    k1, k2, k3, k4, k5 = jax.random.split(key, 5)

    x = jax.random.normal(k1, (batch, input_chans, H, W), jnp.float32)
    h0 = jax.random.normal(k2, (batch, num_features, H, W), jnp.float32)
    c0 = jax.random.normal(k3, (batch, num_features, H, W), jnp.float32)

    ct = input_chans + num_features
    weight = 0.1 * jax.random.normal(
        k4, (4 * num_features, ct, filter_size, filter_size), jnp.float32
    )
    bias = 0.1 * jax.random.normal(k5, (4 * num_features,), jnp.float32)

    fwd = jax.jit(functools.partial(clstm_cell_forward, filter_size=filter_size))
    next_h, next_c = fwd(x, (h0, c0), weight, bias)
    jax.block_until_ready((next_h, next_c))

    ref_h, ref_c = _reference_forward(x, (h0, c0), weight, bias, filter_size)
    # bf16 MXU operands (f32 accumulation) -> relaxed tolerance vs f32 reference.
    assert jnp.allclose(next_h, ref_h, atol=5e-2, rtol=5e-2), "next_h mismatch"
    assert jnp.allclose(next_c, ref_c, atol=5e-2, rtol=5e-2), "next_c mismatch"

    print("KERNEL_OK")
</pallas_src>

<mosaic_0001>
module attributes {stable_mosaic.version = 11 : i64} {
  func.func @clstm_kernel(%arg0: i32, %arg1: i32, %arg2: memref<1x18x18x36xbf16, #tpu.memory_space<vmem>>, %arg3: memref<9x36x128xbf16, #tpu.memory_space<vmem>>, %arg4: memref<3x128xf32, #tpu.memory_space<vmem>>, %arg5: memref<1x32x256xf32, #tpu.memory_space<vmem>>, %arg6: memref<1x32x256xf32, #tpu.memory_space<vmem>>, %arg7: memref<1x32x256xf32, #tpu.memory_space<vmem>>) attributes {dimension_semantics = [#tpu.dimension_semantics<parallel>, #tpu.dimension_semantics<arbitrary>], iteration_bounds = array<i64: 2, 1>, scalar_prefetch = 0 : i64, scratch_operands = 0 : i64, tpu.core_type = #tpu.core_type<tc>, window_params = [{transform_indices = @transform_0, window_bounds = array<i64: 1, 18, 18, 36>}, {pipeline_mode = #tpu.pipeline_mode<synchronous>, transform_indices = @transform_1, window_bounds = array<i64: 9, 36, 128>}, {pipeline_mode = #tpu.pipeline_mode<synchronous>, transform_indices = @transform_2, window_bounds = array<i64: 3, 128>}, {transform_indices = @transform_3, window_bounds = array<i64: 1, 32, 256>}, {transform_indices = @transform_4, window_bounds = array<i64: 1, 32, 256>}, {transform_indices = @transform_5, window_bounds = array<i64: 1, 32, 256>}]} {
    %c16_i32 = arith.constant 16 : i32
    %0 = arith.muli %arg1, %c16_i32 : i32
    %1 = tpu.assume_multiple %0, 16 : i32
    %c0 = arith.constant 0 : index
    %2 = arith.index_cast %1 : i32 to index
    %c0_0 = arith.constant 0 : index
    %c0_1 = arith.constant 0 : index
    %3 = vector.load %arg2[%c0, %2, %c0_0, %c0_1] : memref<1x18x18x36xbf16, #tpu.memory_space<vmem>>, vector<1x18x16x36xbf16>
    %4 = vector.shape_cast %3 : vector<1x18x16x36xbf16> to vector<18x16x36xbf16>
    %c0_2 = arith.constant 0 : index
    %5 = arith.index_cast %1 : i32 to index
    %c1 = arith.constant 1 : index
    %c0_3 = arith.constant 0 : index
    %6 = vector.load %arg2[%c0_2, %5, %c1, %c0_3] : memref<1x18x18x36xbf16, #tpu.memory_space<vmem>>, vector<1x18x16x36xbf16>
    %7 = vector.shape_cast %6 : vector<1x18x16x36xbf16> to vector<18x16x36xbf16>
    %c0_4 = arith.constant 0 : index
    %8 = arith.index_cast %1 : i32 to index
    %c2 = arith.constant 2 : index
    %c0_5 = arith.constant 0 : index
    %9 = vector.load %arg2[%c0_4, %8, %c2, %c0_5] : memref<1x18x18x36xbf16, #tpu.memory_space<vmem>>, vector<1x18x16x36xbf16>
    %10 = vector.shape_cast %9 : vector<1x18x16x36xbf16> to vector<18x16x36xbf16>
    %cst = arith.constant 0.000000e+00 : f32
    %11 = vector.broadcast %cst : f32 to vector<256x128xf32>
    %12 = vector.extract_strided_slice %4 {offsets = [0, 0, 0], sizes = [16, 16, 36], strides = [1, 1, 1]} : vector<18x16x36xbf16> to vector<16x16x36xbf16>
    %13 = vector.shape_cast %12 : vector<16x16x36xbf16> to vector<256x36xbf16>
    %c0_6 = arith.constant 0 : index
    %c0_7 = arith.constant 0 : index
    %c0_8 = arith.constant 0 : index
    %14 = vector.load %arg3[%c0_6, %c0_7, %c0_8] : memref<9x36x128xbf16, #tpu.memory_space<vmem>>, vector<1x36x128xbf16>
    %15 = vector.shape_cast %14 : vector<1x36x128xbf16> to vector<36x128xbf16>
    %cst_9 = arith.constant dense<0.000000e+00> : vector<256x128xf32>
    %16 = tpu.matmul %13, %15, %cst_9 {dimension_numbers = #tpu.dot_dimension_numbers<[1], [0], [0], [1], [0, 0, 1, 1], [], []>} : vector<256x36xbf16>, vector<36x128xbf16>, vector<256x128xf32> -> vector<256x128xf32>
    %17 = arith.addf %11, %16 : vector<256x128xf32>
    %18 = vector.extract_strided_slice %7 {offsets = [0, 0, 0], sizes = [16, 16, 36], strides = [1, 1, 1]} : vector<18x16x36xbf16> to vector<16x16x36xbf16>
    %19 = vector.shape_cast %18 : vector<16x16x36xbf16> to vector<256x36xbf16>
    %c1_10 = arith.constant 1 : index
    %c0_11 = arith.constant 0 : index
    %c0_12 = arith.constant 0 : index
    %20 = vector.load %arg3[%c1_10, %c0_11, %c0_12] : memref<9x36x128xbf16, #tpu.memory_space<vmem>>, vector<1x36x128xbf16>
    %21 = vector.shape_cast %20 : vector<1x36x128xbf16> to vector<36x128xbf16>
    %cst_13 = arith.constant dense<0.000000e+00> : vector<256x128xf32>
    %22 = tpu.matmul %19, %21, %cst_13 {dimension_numbers = #tpu.dot_dimension_numbers<[1], [0], [0], [1], [0, 0, 1, 1], [], []>} : vector<256x36xbf16>, vector<36x128xbf16>, vector<256x128xf32> -> vector<256x128xf32>
    %23 = arith.addf %17, %22 : vector<256x128xf32>
    %24 = vector.extract_strided_slice %10 {offsets = [0, 0, 0], sizes = [16, 16, 36], strides = [1, 1, 1]} : vector<18x16x36xbf16> to vector<16x16x36xbf16>
    %25 = vector.shape_cast %24 : vector<16x16x36xbf16> to vector<256x36xbf16>
    %c2_14 = arith.constant 2 : index
    %c0_15 = arith.constant 0 : index
    %c0_16 = arith.constant 0 : index
    %26 = vector.load %arg3[%c2_14, %c0_15, %c0_16] : memref<9x36x128xbf16, #tpu.memory_space<vmem>>, vector<1x36x128xbf16>
    %27 = vector.shape_cast %26 : vector<1x36x128xbf16> to vector<36x128xbf16>
    %cst_17 = arith.constant dense<0.000000e+00> : vector<256x128xf32>
    %28 = tpu.matmul %25, %27, %cst_17 {dimension_numbers = #tpu.dot_dimension_numbers<[1], [0], [0], [1], [0, 0, 1, 1], [], []>} : vector<256x36xbf16>, vector<36x128xbf16>, vector<256x128xf32> -> vector<256x128xf32>
    %29 = arith.addf %23, %28 : vector<256x128xf32>
    %30 = vector.extract_strided_slice %4 {offsets = [1, 0, 0], sizes = [16, 16, 36], strides = [1, 1, 1]} : vector<18x16x36xbf16> to vector<16x16x36xbf16>
    %31 = vector.shape_cast %30 : vector<16x16x36xbf16> to vector<256x36xbf16>
    %c3 = arith.constant 3 : index
    %c0_18 = arith.constant 0 : index
    %c0_19 = arith.constant 0 : index
    %32 = vector.load %arg3[%c3, %c0_18, %c0_19] : memref<9x36x128xbf16, #tpu.memory_space<vmem>>, vector<1x36x128xbf16>
    %33 = vector.shape_cast %32 : vector<1x36x128xbf16> to vector<36x128xbf16>
    %cst_20 = arith.constant dense<0.000000e+00> : vector<256x128xf32>
    %34 = tpu.matmul %31, %33, %cst_20 {dimension_numbers = #tpu.dot_dimension_numbers<[1], [0], [0], [1], [0, 0, 1, 1], [], []>} : vector<256x36xbf16>, vector<36x128xbf16>, vector<256x128xf32> -> vector<256x128xf32>
    %35 = arith.addf %29, %34 : vector<256x128xf32>
    %36 = vector.extract_strided_slice %7 {offsets = [1, 0, 0], sizes = [16, 16, 36], strides = [1, 1, 1]} : vector<18x16x36xbf16> to vector<16x16x36xbf16>
    %37 = vector.shape_cast %36 : vector<16x16x36xbf16> to vector<256x36xbf16>
    %c4 = arith.constant 4 : index
    %c0_21 = arith.constant 0 : index
    %c0_22 = arith.constant 0 : index
    %38 = vector.load %arg3[%c4, %c0_21, %c0_22] : memref<9x36x128xbf16, #tpu.memory_space<vmem>>, vector<1x36x128xbf16>
    %39 = vector.shape_cast %38 : vector<1x36x128xbf16> to vector<36x128xbf16>
    %cst_23 = arith.constant dense<0.000000e+00> : vector<256x128xf32>
    %40 = tpu.matmul %37, %39, %cst_23 {dimension_numbers = #tpu.dot_dimension_numbers<[1], [0], [0], [1], [0, 0, 1, 1], [], []>} : vector<256x36xbf16>, vector<36x128xbf16>, vector<256x128xf32> -> vector<256x128xf32>
    %41 = arith.addf %35, %40 : vector<256x128xf32>
    %42 = vector.extract_strided_slice %10 {offsets = [1, 0, 0], sizes = [16, 16, 36], strides = [1, 1, 1]} : vector<18x16x36xbf16> to vector<16x16x36xbf16>
    %43 = vector.shape_cast %42 : vector<16x16x36xbf16> to vector<256x36xbf16>
    %c5 = arith.constant 5 : index
    %c0_24 = arith.constant 0 : index
    %c0_25 = arith.constant 0 : index
    %44 = vector.load %arg3[%c5, %c0_24, %c0_25] : memref<9x36x128xbf16, #tpu.memory_space<vmem>>, vector<1x36x128xbf16>
    %45 = vector.shape_cast %44 : vector<1x36x128xbf16> to vector<36x128xbf16>
    %cst_26 = arith.constant dense<0.000000e+00> : vector<256x128xf32>
    %46 = tpu.matmul %43, %45, %cst_26 {dimension_numbers = #tpu.dot_dimension_numbers<[1], [0], [0], [1], [0, 0, 1, 1], [], []>} : vector<256x36xbf16>, vector<36x128xbf16>, vector<256x128xf32> -> vector<256x128xf32>
    %47 = arith.addf %41, %46 : vector<256x128xf32>
    %48 = vector.extract_strided_slice %4 {offsets = [2, 0, 0], sizes = [16, 16, 36], strides = [1, 1, 1]} : vector<18x16x36xbf16> to vector<16x16x36xbf16>
    %49 = vector.shape_cast %48 : vector<16x16x36xbf16> to vector<256x36xbf16>
    %c6 = arith.constant 6 : index
    %c0_27 = arith.constant 0 : index
    %c0_28 = arith.constant 0 : index
    %50 = vector.load %arg3[%c6, %c0_27, %c0_28] : memref<9x36x128xbf16, #tpu.memory_space<vmem>>, vector<1x36x128xbf16>
    %51 = vector.shape_cast %50 : vector<1x36x128xbf16> to vector<36x128xbf16>
    %cst_29 = arith.constant dense<0.000000e+00> : vector<256x128xf32>
    %52 = tpu.matmul %49, %51, %cst_29 {dimension_numbers = #tpu.dot_dimension_numbers<[1], [0], [0], [1], [0, 0, 1, 1], [], []>} : vector<256x36xbf16>, vector<36x128xbf16>, vector<256x128xf32> -> vector<256x128xf32>
    %53 = arith.addf %47, %52 : vector<256x128xf32>
    %54 = vector.extract_strided_slice %7 {offsets = [2, 0, 0], sizes = [16, 16, 36], strides = [1, 1, 1]} : vector<18x16x36xbf16> to vector<16x16x36xbf16>
    %55 = vector.shape_cast %54 : vector<16x16x36xbf16> to vector<256x36xbf16>
    %c7 = arith.constant 7 : index
    %c0_30 = arith.constant 0 : index
    %c0_31 = arith.constant 0 : index
    %56 = vector.load %arg3[%c7, %c0_30, %c0_31] : memref<9x36x128xbf16, #tpu.memory_space<vmem>>, vector<1x36x128xbf16>
    %57 = vector.shape_cast %56 : vector<1x36x128xbf16> to vector<36x128xbf16>
    %cst_32 = arith.constant dense<0.000000e+00> : vector<256x128xf32>
    %58 = tpu.matmul %55, %57, %cst_32 {dimension_numbers = #tpu.dot_dimension_numbers<[1], [0], [0], [1], [0, 0, 1, 1], [], []>} : vector<256x36xbf16>, vector<36x128xbf16>, vector<256x128xf32> -> vector<256x128xf32>
    %59 = arith.addf %53, %58 : vector<256x128xf32>
    %60 = vector.extract_strided_slice %10 {offsets = [2, 0, 0], sizes = [16, 16, 36], strides = [1, 1, 1]} : vector<18x16x36xbf16> to vector<16x16x36xbf16>
    %61 = vector.shape_cast %60 : vector<16x16x36xbf16> to vector<256x36xbf16>
    %c8 = arith.constant 8 : index
    %c0_33 = arith.constant 0 : index
    %c0_34 = arith.constant 0 : index
    %62 = vector.load %arg3[%c8, %c0_33, %c0_34] : memref<9x36x128xbf16, #tpu.memory_space<vmem>>, vector<1x36x128xbf16>
    %63 = vector.shape_cast %62 : vector<1x36x128xbf16> to vector<36x128xbf16>
    %cst_35 = arith.constant dense<0.000000e+00> : vector<256x128xf32>
    %64 = tpu.matmul %61, %63, %cst_35 {dimension_numbers = #tpu.dot_dimension_numbers<[1], [0], [0], [1], [0, 0, 1, 1], [], []>} : vector<256x36xbf16>, vector<36x128xbf16>, vector<256x128xf32> -> vector<256x128xf32>
    %65 = arith.addf %59, %64 : vector<256x128xf32>
    %c0_36 = arith.constant 0 : index
    %c0_37 = arith.constant 0 : index
    %66 = vector.load %arg4[%c0_36, %c0_37] : memref<3x128xf32, #tpu.memory_space<vmem>>, vector<1x128xf32>
    %c1_38 = arith.constant 1 : index
    %c0_39 = arith.constant 0 : index
    %67 = vector.load %arg4[%c1_38, %c0_39] : memref<3x128xf32, #tpu.memory_space<vmem>>, vector<1x128xf32>
    %c2_40 = arith.constant 2 : index
    %c0_41 = arith.constant 0 : index
    %68 = vector.load %arg4[%c2_40, %c0_41] : memref<3x128xf32, #tpu.memory_space<vmem>>, vector<1x128xf32>
    %69 = vector.broadcast %66 : vector<1x128xf32> to vector<256x128xf32>
    %70 = arith.addf %65, %69 : vector<256x128xf32>
    %71 = math.tanh %70 : vector<256x128xf32>
    %72 = vector.broadcast %67 : vector<1x128xf32> to vector<256x128xf32>
    %73 = arith.mulf %71, %72 : vector<256x128xf32>
    %74 = vector.broadcast %68 : vector<1x128xf32> to vector<256x128xf32>
    %75 = arith.addf %73, %74 : vector<256x128xf32>
    %76 = tpu.transpose %75, [1, 0] : vector<256x128xf32> -> vector<128x256xf32>
    %77 = vector.extract_strided_slice %76 {offsets = [0, 0], sizes = [32, 256], strides = [1, 1]} : vector<128x256xf32> to vector<32x256xf32>
    %78 = vector.extract_strided_slice %76 {offsets = [32, 0], sizes = [32, 256], strides = [1, 1]} : vector<128x256xf32> to vector<32x256xf32>
    %79 = vector.extract_strided_slice %76 {offsets = [64, 0], sizes = [32, 256], strides = [1, 1]} : vector<128x256xf32> to vector<32x256xf32>
    %80 = vector.extract_strided_slice %76 {offsets = [96, 0], sizes = [32, 256], strides = [1, 1]} : vector<128x256xf32> to vector<32x256xf32>
    %c0_42 = arith.constant 0 : index
    %c0_43 = arith.constant 0 : index
    %c0_44 = arith.constant 0 : index
    %81 = vector.load %arg5[%c0_42, %c0_43, %c0_44] : memref<1x32x256xf32, #tpu.memory_space<vmem>>, vector<1x32x256xf32>
    %82 = vector.shape_cast %81 : vector<1x32x256xf32> to vector<32x256xf32>
    %83 = arith.mulf %78, %82 : vector<32x256xf32>
    %84 = arith.mulf %77, %80 : vector<32x256xf32>
    %85 = arith.addf %83, %84 : vector<32x256xf32>
    %86 = math.tanh %85 : vector<32x256xf32>
    %87 = arith.mulf %79, %86 : vector<32x256xf32>
    %c0_45 = arith.constant 0 : index
    %c0_46 = arith.constant 0 : index
    %c0_47 = arith.constant 0 : index
    %88 = vector.load %arg7[%c0_45, %c0_46, %c0_47] : memref<1x32x256xf32, #tpu.memory_space<vmem>>, vector<1x32x256xf32>
    %89 = vector.shape_cast %88 : vector<1x32x256xf32> to vector<32x256xf32>
    %90 = vector.shape_cast %85 : vector<32x256xf32> to vector<1x32x256xf32>
    tpu.vector_store %arg7[%c0_45, %c0_46, %c0_47], %90 {strides = array<i32>} : memref<1x32x256xf32, #tpu.memory_space<vmem>>, vector<1x32x256xf32>,
    %c0_48 = arith.constant 0 : index
    %c0_49 = arith.constant 0 : index
    %c0_50 = arith.constant 0 : index
    %91 = vector.load %arg6[%c0_48, %c0_49, %c0_50] : memref<1x32x256xf32, #tpu.memory_space<vmem>>, vector<1x32x256xf32>
    %92 = vector.shape_cast %91 : vector<1x32x256xf32> to vector<32x256xf32>
    %93 = vector.shape_cast %87 : vector<32x256xf32> to vector<1x32x256xf32>
    tpu.vector_store %arg6[%c0_48, %c0_49, %c0_50], %93 {strides = array<i32>} : memref<1x32x256xf32, #tpu.memory_space<vmem>>, vector<1x32x256xf32>,
    return
  }
  func.func @transform_0(%arg0: i32, %arg1: i32) -> (i32, i32, i32, i32) {
    %c0_i32 = arith.constant 0 : i32
    %c0_i32_0 = arith.constant 0 : i32
    %c0_i32_1 = arith.constant 0 : i32
    %c0_i32_2 = arith.constant 0 : i32
    return %arg0, %c0_i32, %c0_i32_0, %c0_i32_1 : i32, i32, i32, i32
  }
  func.func @transform_1(%arg0: i32, %arg1: i32) -> (i32, i32, i32) {
    %c0_i32 = arith.constant 0 : i32
    %c0_i32_0 = arith.constant 0 : i32
    %c0_i32_1 = arith.constant 0 : i32
    %c0_i32_2 = arith.constant 0 : i32
    return %c0_i32, %c0_i32_0, %c0_i32_1 : i32, i32, i32
  }
  func.func @transform_2(%arg0: i32, %arg1: i32) -> (i32, i32) {
    %c0_i32 = arith.constant 0 : i32
    %c0_i32_0 = arith.constant 0 : i32
    %c0_i32_1 = arith.constant 0 : i32
    return %c0_i32, %c0_i32_0 : i32, i32
  }
  func.func @transform_3(%arg0: i32, %arg1: i32) -> (i32, i32, i32) {
    %c0_i32 = arith.constant 0 : i32
    %c0_i32_0 = arith.constant 0 : i32
    return %arg0, %c0_i32, %arg1 : i32, i32, i32
  }
  func.func @transform_4(%arg0: i32, %arg1: i32) -> (i32, i32, i32) {
    %c0_i32 = arith.constant 0 : i32
    %c0_i32_0 = arith.constant 0 : i32
    return %arg0, %c0_i32, %arg1 : i32, i32, i32
  }
  func.func @transform_5(%arg0: i32, %arg1: i32) -> (i32, i32, i32) {
    %c0_i32 = arith.constant 0 : i32
    %c0_i32_0 = arith.constant 0 : i32
    return %arg0, %c0_i32, %arg1 : i32, i32, i32
  }
}

</mosaic_0001>

<bundles_post_ra>
// kernel: clstm_cell_forward.1
= control target key start
LH: loop header
LB: loop body
LE: loop exit
PB: predicated region body
PF: predicated region fallthrough
CT: control target
= control target key end

     0   :  { %s3578_s18 = smov 0   ;;  %s3580_s19 = smov 0   ;;  %s4829_s0 = inlined_call_operand.vmem [shape: bf16[2,18,18,36], index: 0, kind: input, shape index: {}]   ;;  %s4830_s1 = inlined_call_operand.vmem [shape: bf16[9,36,128], index: 1, kind: input, shape index: {}]   ;;  %s4831_s2 = inlined_call_operand.vmem [shape: f32[3,128], index: 2, kind: input, shape index: {}]   ;;  %s4832_s3 = inlined_call_operand.vmem [shape: f32[2,32,256], index: 3, kind: input, shape index: {}]   ;;  %s4833_s4 = inlined_call_operand.vmem [shape: f32[2,32,256], index: 4, kind: output, shape index: {0}]   ;;  %s4834_s5 = inlined_call_operand.vmem [shape: f32[2,32,256], index: 5, kind: output, shape index: {1}]  }
   0x1   :  { %s3582_s20 = smov 0  }
   0x2 LB: > { %s28_s21 = sadd.s32 1, %s3542_s19  ;;  %p3004_p0 = scmp.ge.s32.totalorder %s3546_s20, 1  ;;  %s3546_s20 = sphi %s3582_s20, %s16_s20   ;;  %s3542_s19 = sphi %s3580_s19, %s4938_s19   ;;  %s3538_s18 = sphi %s3578_s18, %s4937_s18  }
   0x3   : > { %p30_p1 = scmp.ge.s32.totalorder %s28_s21, 2  ;;  %p223_p2 = scmp.lt.s32.totalorder %s3546_s20, 3 }
   0x5   : > { %s4940_s21 = smov (%p30_p1, %s28_s21), 0  ;;  %p224_p3 = pnand %p3004_p0, %p223_p2 }
   0x7   : > { %227 = sbr.rel (%p224_p3) target bundleno = 947 (0x3b3), region = 36 }
   0xc   : > { %v3016_v0 = vld [vmem:[%s4830_s1 + $0x24] sm:$0x3]  ;;  %p273_p4 = scmp.lt.s32.totalorder %s3538_s18, 1  ;;  %vm895_vm0 = vcmask 1041408   ;;  %v3149_v2 = vld [vmem:[%s4830_s1 + $0x38] sm:$0x3] }
   0xd   : > { %v840_v1 = vunpack.c.l.b16 %v3016_v0  ;;  %v1433_v4 = vunpack.c.l.b16 %v3149_v2  ;;  %v3178_v5 = vld [vmem:[%s4830_s1 + $0x4c] sm:$0x3]  ;;  %v389_v6 = vld [vmem:[%s4830_s1 + $0x10] sm:$0x3]  ;;  %v3384_v8 = vld [vmem:[%s4830_s1 + $0x1c] sm:$0xff]  ;;  %vm846_vm3 = vcmask 293888  }
   0xe   : > { %s4942_s18 = smov (!%p273_p4, %s3538_s18), 1  ;;  %v1631_v9 = vunpack.c.l.b16 %v3178_v5  ;;  %vm390_vm1 = vsmask.f32 3328  ;;  %vm391_vm2 = vsmask.f32 7440  ;;  %v1077_v15 = vunpack.c.l.b16 %v389_v6  ;;  %v3383_v16 = vld [vmem:[%s4830_s1 + $0x14] sm:$0xff] }
   0xf   : > { %v843_v3 = vpack.c.b16 %v840_v1, %v840_v1  ;;  %s3408_s26 = smul.u32 216, %s4942_s18  ;;  %v3623_v10 = vld [vmem:[%s4830_s1 + $0x60] sm:$0x3]  ;;  %v3632_v14 = vpack.c.b16 %v1433_v4, %v1433_v4  ;;  %vm3650_vm4 = vmor %vm390_vm1, %vm391_vm2  ;;  %vm1255_vm5 = vcmask 1042432   ;;  %vm1256_vm6 = vcmask 1046532  }
  0x10   : > { %v3643_v26 = vpack.c.b16 %v1631_v9, %v1631_v9  ;;  %v1806_v27 = vunpack.c.l.b16 %v3623_v10  ;;  %v3654_v46 = vpack.c.b16 %v1077_v15, %v1077_v15  ;;  %vm3935_vm7 = vmor %vm1255_vm5, %vm1256_vm6 }
  0x11   : > { %v897_v7 = vsel %vm895_vm0, %v843_v3, 0  ;;  %s3618_s10 = scalar_lea.vmem %s4829_s0, %s3408_s26  ;;  %s3360_s26 = sshll.u32 %s4942_s18, 6 }
  0x12   : > { %3399 = vmatpush.bf16.msra.mxu1 %v897_v7  ;;  %3400 = vmatpush.bf16.msra.mxu2 %v897_v7  ;;  %v321_v11 = vld [vmem:[%s3618_s10 + $0x30] sm:$0xf]  ;;  %v3627_v12 = vld [vmem:[%s3618_s10 + $0x34] sm:$0xf]  ;;  %v3630_v13 = vld [vmem:[%s3618_s10 + $0x38] sm:$0x1]  ;;  %v1809_v9 = vpack.c.b16 %v1806_v27, %v1806_v27  ;;  %s4777_s29 = scalar_lea.vmem %s4832_s3, %s3360_s26  ;;  %s4785_s7 = scalar_lea.vmem %s4834_s5, %s3360_s26 }
  0x13   : > { %3401 = vmatpush.bf16.msra.mxu3 %v897_v7  ;;  %904 = vmatpush.bf16.msra.mxu0 %v897_v7  ;;  %v490_v17 = vshrl.u32 %v321_v11, 16  ;;  %v493_v18 = vshll.u32 %v321_v11, 16  ;;  %v499_v19 = vshll.u32 %v3627_v12, 16  ;;  %v503_v20 = vshrl.u32 %v3627_v12, 16  ;;  %v329_v21 = vld [vmem:[%s3618_s10 + $0x60] sm:$0xf]  ;;  %s4794_s9 = scalar_lea.vmem %s4833_s4, %s3360_s26 }
  0x14   : > { %v509_v22 = vshll.u32 %v3630_v13, 16  ;;  %v330_v23 = vld [vmem:[%s3618_s10 + $0x64] sm:$0xf]  ;;  %v357_v24 = vld [vmem:[%s3618_s10 + $0x68] sm:$0x1]  ;;  %v586_v25 = vshrl.u32 %v329_v21, 16 }
  0x15   : > { %v492_v28 = vrot.slane %v490_v17, 4  ;;  %v495_v29 = vrot.slane %v493_v18, 5  ;;  %v501_v30 = vrot.slane %v499_v19, 5  ;;  %v505_v31 = vrot.slane %v503_v20, 4  ;;  %v337_v32 = vld [vmem:[%s3618_s10 + $0x90] sm:$0xf] }
  0x16   : > { %3402 = vmatpush.bf16.msra.mxu1 %v3384_v8  ;;  %3403 = vmatpush.bf16.msra.mxu2 %v3384_v8  ;;  %v511_v33 = vrot.slane %v509_v22, 5  ;;  %v588_v34 = vrot.slane %v586_v25, 4  ;;  %v589_v35 = vshll.u32 %v329_v21, 16  ;;  %v595_v36 = vshll.u32 %v330_v23, 16  ;;  %v338_v41 = vld [vmem:[%s3618_s10 + $0x94] sm:$0xf] }
  0x17   : > { %3404 = vmatpush.bf16.msra.mxu3 %v3384_v8  ;;  %905 = vmatpush.bf16.msra.mxu0 %v3384_v8  ;;  %v496_v37 = vor.u32 %v495_v29, %v492_v28  ;;  %v506_v38 = vor.u32 %v505_v31, %v501_v30  ;;  %v599_v39 = vshrl.u32 %v330_v23, 16  ;;  %v605_v40 = vshll.u32 %v357_v24, 16  ;;  %v361_v52 = vld [vmem:[%s3618_s10 + $0x98] sm:$0x1]  ;;  %v313_v4 = vld [vmem:[%s3618_s10] sm:$0xf] }
  0x18   : > { %v591_v43 = vrot.slane %v589_v35, 5  ;;  %v597_v44 = vrot.slane %v595_v36, 5  ;;  %v682_v45 = vshrl.u32 %v337_v32, 16  ;;  %v685_v54 = vshll.u32 %v337_v32, 16  ;;  %v3667_v8 = vld [vmem:[%s3618_s10 + $0x4] sm:$0xf] }
  0x19   : > { %v497_v47 = vrot.slane %v496_v37, 4  ;;  %v507_v48 = vrot.slane %v506_v38, 4  ;;  %v601_v49 = vrot.slane %v599_v39, 4  ;;  %v607_v50 = vrot.slane %v605_v40, 5  ;;  %v3672_v17 = vld [vmem:[%s3618_s10 + $0x8] sm:$0x1] }
  0x1a   : > { %3405 = vmatpush.bf16.msra.mxu1 %v3383_v16  ;;  %3406 = vmatpush.bf16.msra.mxu2 %v3383_v16  ;;  %v592_v51 = vor.u32 %v591_v43, %v588_v34  ;;  %v684_v53 = vrot.slane %v682_v45, 4  ;;  %v691_v55 = vshll.u32 %v338_v41, 16  ;;  %v695_v59 = vshrl.u32 %v338_v41, 16  ;;  %v323_v34 = vld [vmem:[%s3618_s10 + $0x3c] sm:$0xf]  ;;  %v3386_v35 = vld [vmem:[%s4830_s1 + $0x30] sm:$0xff] }
  0x1b   : > { %3407 = vmatpush.bf16.msra.mxu3 %v3383_v16  ;;  %906 = vmatpush.bf16.msra.mxu0 %v3383_v16  ;;  %v502_v56 = vsel %vm3650_vm4, %v497_v47, %v501_v30  ;;  %v512_v57 = vsel %vm3650_vm4, %v507_v48, %v511_v33  ;;  %v602_v58 = vor.u32 %v601_v49, %v597_v44  ;;  %v687_v63 = vrot.slane %v685_v54, 5  ;;  %v3694_v39 = vld [vmem:[%s3618_s10 + $0x40] sm:$0xf]  ;;  %v3697_v40 = vld [vmem:[%s3618_s10 + $0x44] sm:$0x1] }
  0x1c   : > { %v791_v60 = vunpack.c.l.b16 %v502_v56  ;;  %v792_v61 = vunpack.c.l.b16 %v512_v57  ;;  %v593_v62 = vrot.slane %v592_v51, 4  ;;  %v693_v1 = vrot.slane %v691_v55, 5  ;;  %v331_v47 = vld [vmem:[%s3618_s10 + $0x6c] sm:$0xf] }
  0x1d   : > { %v603_v0 = vrot.slane %v602_v58, 4  ;;  %v697_v2 = vrot.slane %v695_v59, 4  ;;  %v701_v3 = vshll.u32 %v361_v52, 16  ;;  %v688_v7 = vor.u32 %v687_v63, %v684_v53  ;;  %v3388_v52 = vld [vmem:[%s4830_s1 + $0x44] sm:$0xff]  ;;  %v3719_v59 = vld [vmem:[%s3618_s10 + $0x70] sm:$0xf] }
  0x1e   : > { %v3662_v5 = vpack.c.b16 %v792_v61, %v791_v60  ;;  %v598_v6 = vsel %vm3650_vm4, %v593_v62, %v597_v44  ;;  %v1488_v20 = vsel %vm895_vm0, %v3632_v14, 0  ;;  %v394_v21 = vshrl.u32 %v313_v4, 16 }
  0x1f   : > { %v608_v10 = vsel %vm3650_vm4, %v603_v0, %v607_v50  ;;  %v799_v11 = vunpack.c.l.b16 %v598_v6  ;;  %v698_v15 = vor.u32 %v697_v2, %v693_v1  ;;  %v703_v16 = vrot.slane %v701_v3, 5  ;;  %1495 = vmatpush.bf16.msrb.mxu2 %v1488_v20 }
  0x20   : > { %3029 = vmatmul.msk.bf16.vlgmr.msra.gmra.mxu1 %vm846_vm3, %v3662_v5  ;;  %v800_v18 = vunpack.c.l.b16 %v608_v10  ;;  %v689_v19 = vrot.slane %v688_v7, 4  ;;  %v397_v23 = vshll.u32 %v313_v4, 16  ;;  %v403_v24 = vshll.u32 %v3667_v8, 16 }
  0x21   : > { %v699_v22 = vrot.slane %v698_v15, 4  ;;  %v407_v25 = vshrl.u32 %v3667_v8, 16  ;;  %v396_v29 = vrot.slane %v394_v21, 4  ;;  %v413_v30 = vshll.u32 %v3672_v17, 16  ;;  %v339_v15 = vld [vmem:[%s3618_s10 + $0x9c] sm:$0xf] }
  0x22   : > { %v3680_v27 = vpack.c.b16 %v800_v18, %v799_v11  ;;  %v694_v28 = vsel %vm3650_vm4, %v689_v19, %v693_v1  ;;  %v399_v32 = vrot.slane %v397_v23, 5  ;;  %v405_v33 = vrot.slane %v403_v24, 5  ;;  %v3724_v1 = vld [vmem:[%s3618_s10 + $0x74] sm:$0x1]  ;;  %v340_v24 = vld [vmem:[%s3618_s10 + $0xa0] sm:$0xf] }
  0x23   : > { %v704_v14 = vsel %vm3650_vm4, %v699_v22, %v703_v16  ;;  %v807_v31 = vunpack.c.l.b16 %v694_v28  ;;  %v409_v37 = vrot.slane %v407_v25, 4  ;;  %v415_v38 = vrot.slane %v413_v30, 5  ;;  %1496 = vmatpush.bf16.msrb.mxu2 %v3386_v35  ;;  %v362_v30 = vld [vmem:[%s3618_s10 + $0xa4] sm:$0x1] }
  0x24   : > { %4861 = vst [vmem:[#allocation2_spill] sm:$0xff] %v3680_v27  ;;  %3033 = vmatmul.msk.bf16.vlgmr.msra.gmra.mxu2 %vm846_vm3, %v3680_v27  ;;  %v808_v36 = vunpack.c.l.b16 %v704_v14  ;;  %v400_v41 = vor.u32 %v399_v32, %v396_v29  ;;  %v1641_v43 = vsel %vm895_vm0, %v3643_v26, 0  ;;  %v1132_v44 = vsel %vm895_vm0, %v3654_v46, 0  ;;  %v3382_v26 = vld [vmem:[%s4830_s1 + $0x8] sm:$0xff] }
  0x25   : > { %v1816_v45 = vsel %vm895_vm0, %v1809_v9, 0  ;;  %v410_v49 = vor.u32 %v409_v37, %v405_v33  ;;  %1648 = vmatpush.bf16.msrb.mxu3 %v1641_v43  ;;  %1139 = vmatpush.bf16.msrb.mxu1 %v1132_v44  ;;  %v514_v50 = vshrl.u32 %v323_v34, 16  ;;  %v517_v51 = vshll.u32 %v323_v34, 16 }
  0x26   : > { %v3705_v48 = vpack.c.b16 %v808_v36, %v807_v31  ;;  %v401_v46 = vrot.slane %v400_v41, 4  ;;  %1823 = vmatpush.bf16.msrb.mxu0 %v1816_v45  ;;  %v523_v53 = vshll.u32 %v3694_v39, 16  ;;  %v527_v54 = vshrl.u32 %v3694_v39, 16  ;;  %v315_v41 = vld [vmem:[%s3618_s10 + $0xc] sm:$0xf] }
  0x27   : > { %v533_v55 = vshll.u32 %v3697_v40, 16  ;;  %v411_v56 = vrot.slane %v410_v49, 4  ;;  %v516_v57 = vrot.slane %v514_v50, 4  ;;  %v519_v58 = vrot.slane %v517_v51, 5  ;;  %v3390_v49 = vld [vmem:[%s4830_s1 + $0x58] sm:$0xff] }
  0x28   : > { %4862 = vst [vmem:[#allocation3_spill] sm:$0xff] %v3705_v48  ;;  %3037 = vmatmul.msk.bf16.vlgmr.msra.gmra.mxu3 %vm846_vm3, %v3705_v48  ;;  %v610_v60 = vshrl.u32 %v331_v47, 16  ;;  %v406_v61 = vsel %vm3650_vm4, %v401_v46, %v405_v33  ;;  %v525_v62 = vrot.slane %v523_v53, 5  ;;  %v529_v63 = vrot.slane %v527_v54, 4 }
  0x29   : > { %v535_v0 = vrot.slane %v533_v55, 5  ;;  %v416_v2 = vsel %vm3650_vm4, %v411_v56, %v415_v38  ;;  %v783_v3 = vunpack.c.l.b16 %v406_v61  ;;  %v520_v4 = vor.u32 %v519_v58, %v516_v57  ;;  %1649 = vmatpush.bf16.msrb.mxu3 %v3388_v52  ;;  %1140 = vmatpush.bf16.msrb.mxu1 %v3382_v26  ;;  %v3746_v26 = vld [vmem:[%s3618_s10 + $0x10] sm:$0xf]  ;;  %v3751_v56 = vld [vmem:[%s3618_s10 + $0x14] sm:$0x1] }
  0x2a   : > { %v612_v6 = vrot.slane %v610_v60, 4  ;;  %v784_v7 = vunpack.c.l.b16 %v416_v2  ;;  %v530_v9 = vor.u32 %v529_v63, %v525_v62  ;;  %v613_v10 = vshll.u32 %v331_v47, 16  ;;  %1824 = vmatpush.bf16.msrb.mxu0 %v3390_v49 }
  0x2b   : > { %v619_v11 = vshll.u32 %v3719_v59, 16  ;;  %v521_v16 = vrot.slane %v520_v4, 4  ;;  %v623_v18 = vshrl.u32 %v3719_v59, 16  ;;  %v629_v19 = vshll.u32 %v3724_v1, 16  ;;  %v3760_v4 = vld [vmem:[%s3618_s10 + $0x4c] sm:$0xf] }
  0x2c   : > { %v815_v20 = vpack.c.b16 %v784_v7, %v783_v3  ;;  %v531_v21 = vrot.slane %v530_v9, 4  ;;  %v615_v22 = vrot.slane %v613_v10, 5  ;;  %v706_v14 = vshrl.u32 %v339_v15, 16  ;;  %v325_v3 = vld [vmem:[%s3618_s10 + $0x48] sm:$0xf] }
  0x2d   : > { %v621_v23 = vrot.slane %v619_v11, 5  ;;  %v526_v25 = vsel %vm3650_vm4, %v521_v16, %v525_v62  ;;  %v625_v28 = vrot.slane %v623_v18, 4  ;;  %v631_v29 = vrot.slane %v629_v19, 5  ;;  %v3385_v11 = vld [vmem:[%s4830_s1 + $0x28] sm:$0xff] }
  0x2e   : > { %3025 = vmatmul.msk.bf16.vlgmr.msra.gmra.mxu0 %vm846_vm3, %v815_v20  ;;  %v536_v31 = vsel %vm3650_vm4, %v531_v21, %v535_v0  ;;  %v793_v32 = vunpack.c.l.b16 %v526_v25  ;;  %v616_v33 = vor.u32 %v615_v22, %v612_v6  ;;  %v709_v34 = vshll.u32 %v339_v15, 16  ;;  %v3387_v15 = vld [vmem:[%s4830_s1 + $0x3c] sm:$0xff]  ;;  %1497 = vmatpush.bf16.msrb.mxu2 %v3385_v11 }
  0x2f   : > { %v794_v35 = vunpack.c.l.b16 %v536_v31  ;;  %v626_v36 = vor.u32 %v625_v28, %v621_v23  ;;  %v708_v37 = vrot.slane %v706_v14, 4  ;;  %v715_v38 = vshll.u32 %v340_v24, 16  ;;  %v3381_v21 = vld [vmem:[%s4830_s1] sm:$0xff]  ;;  %v3778_v28 = vld [vmem:[%s3618_s10 + $0x50] sm:$0x1]  ;;  %1650 = vmatpush.bf16.msrb.mxu3 %v3387_v15 }
  0x30   : > { %v617_v43 = vrot.slane %v616_v33, 4  ;;  %v711_v44 = vrot.slane %v709_v34, 5  ;;  %v719_v45 = vshrl.u32 %v340_v24, 16  ;;  %v725_v47 = vshll.u32 %v362_v30, 16  ;;  %1141 = vmatpush.bf16.msrb.mxu1 %v3381_v21 }
  0x31   : > { %v3743_v50 = vpack.c.b16 %v794_v35, %v793_v32  ;;  %v627_v51 = vrot.slane %v626_v36, 4  ;;  %v717_v52 = vrot.slane %v715_v38, 5  ;;  %v418_v60 = vshrl.u32 %v315_v41, 16  ;;  %v333_v36 = vld [vmem:[%s3618_s10 + $0x78] sm:$0xf] }
  0x32   : > { %v622_v46 = vsel %vm3650_vm4, %v617_v43, %v621_v23  ;;  %v712_v53 = vor.u32 %v711_v44, %v708_v37  ;;  %v721_v54 = vrot.slane %v719_v45, 4  ;;  %v727_v55 = vrot.slane %v725_v47, 5  ;;  %v3789_v44 = vld [vmem:[%s3618_s10 + $0x7c] sm:$0xf] }
  0x33   : > { %4863 = vst [vmem:[#allocation4_spill] sm:$0xff] %v3743_v50  ;;  %3030 = vmatmul.msk.bf16.gmra.mxu1 %vm846_vm3, %v3743_v50  ;;  %v632_v57 = vsel %vm3650_vm4, %v627_v51, %v631_v29  ;;  %v801_v58 = vunpack.c.l.b16 %v622_v46  ;;  %v421_v61 = vshll.u32 %v315_v41, 16  ;;  %v427_v2 = vshll.u32 %v3746_v26, 16 }
  0x34   : > { %v802_v62 = vunpack.c.l.b16 %v632_v57  ;;  %v713_v63 = vrot.slane %v712_v53, 4  ;;  %v722_v0 = vor.u32 %v721_v54, %v717_v52  ;;  %v420_v6 = vrot.slane %v418_v60, 4  ;;  %v3796_v54 = vld [vmem:[%s3618_s10 + $0x80] sm:$0x1] }
  0x35   : > { %v423_v7 = vrot.slane %v421_v61, 5  ;;  %v431_v9 = vshrl.u32 %v3746_v26, 16  ;;  %v437_v10 = vshll.u32 %v3751_v56, 16  ;;  %v429_v20 = vrot.slane %v427_v2, 5 }
  0x36   : > { %v3770_v16 = vpack.c.b16 %v802_v62, %v801_v58  ;;  %v718_v18 = vsel %vm3650_vm4, %v713_v63, %v717_v52  ;;  %v723_v19 = vrot.slane %v722_v0, 4  ;;  %v538_v30 = vshrl.u32 %v325_v3, 16 }
  0x37   : > { %v809_v22 = vunpack.c.l.b16 %v718_v18  ;;  %v424_v23 = vor.u32 %v423_v7, %v420_v6  ;;  %v433_v24 = vrot.slane %v431_v9, 4  ;;  %v439_v25 = vrot.slane %v437_v10, 5  ;;  %v341_v10 = vld [vmem:[%s3618_s10 + $0xa8] sm:$0xf] }
  0x38   : > { %3034 = vmatmul.msk.bf16.gmra.mxu2 %vm846_vm3, %v3770_v16  ;;  %v728_v29 = vsel %vm3650_vm4, %v723_v19, %v727_v55  ;;  %v541_v14 = vshll.u32 %v325_v3, 16  ;;  %v547_v31 = vshll.u32 %v3760_v4, 16  ;;  %v551_v35 = vshrl.u32 %v3760_v4, 16  ;;  %v3811_v19 = vld [vmem:[%s3618_s10 + $0xac] sm:$0xf] }
  0x39   : > { %v810_v32 = vunpack.c.l.b16 %v728_v29  ;;  %v425_v33 = vrot.slane %v424_v23, 4  ;;  %v434_v34 = vor.u32 %v433_v24, %v429_v20  ;;  %v540_v37 = vrot.slane %v538_v30, 4 }
  0x3a   : > { %v543_v38 = vrot.slane %v541_v14, 5  ;;  %v549_v41 = vrot.slane %v547_v31, 5  ;;  %v557_v43 = vshll.u32 %v3778_v28, 16  ;;  %v553_v51 = vrot.slane %v551_v35, 4 }
  0x3b   : > { %v3791_v45 = vpack.c.b16 %v810_v32, %v809_v22  ;;  %v430_v47 = vsel %vm3650_vm4, %v425_v33, %v429_v20  ;;  %v435_v49 = vrot.slane %v434_v34, 4  ;;  %v634_v55 = vshrl.u32 %v333_v36, 16  ;;  %v363_v20 = vld [vmem:[%s3618_s10 + $0xb0] sm:$0x1] }
  0x3c   : > { %v785_v52 = vunpack.c.l.b16 %v430_v47  ;;  %v544_v46 = vor.u32 %v543_v38, %v540_v37  ;;  %v559_v53 = vrot.slane %v557_v43, 5  ;;  %v554_v58 = vor.u32 %v553_v51, %v549_v41  ;;  %v3826_v51 = vld [vmem:[%s3618_s10 + $0x1c] sm:$0xf] }
  0x3d   : > { %4864 = vst [vmem:[#allocation5_spill] sm:$0xff] %v3791_v45  ;;  %3038 = vmatmul.msk.bf16.gmra.mxu3 %vm846_vm3, %v3791_v45  ;;  %v440_v57 = vsel %vm3650_vm4, %v435_v49, %v439_v25  ;;  %v637_v60 = vshll.u32 %v333_v36, 16  ;;  %v643_v61 = vshll.u32 %v3789_v44, 16  ;;  %v636_v0 = vrot.slane %v634_v55, 4 }
  0x3e   : > { %v786_v62 = vunpack.c.l.b16 %v440_v57  ;;  %v545_v63 = vrot.slane %v544_v46, 4  ;;  %v647_v2 = vshrl.u32 %v3789_v44, 16  ;;  %v555_v3 = vrot.slane %v554_v58, 4 }
  0x3f   : > { %v639_v6 = vrot.slane %v637_v60, 5  ;;  %v645_v7 = vrot.slane %v643_v61, 5  ;;  %v653_v9 = vshll.u32 %v3796_v54, 16  ;;  %v730_v30 = vshrl.u32 %v341_v10, 16 }
  0x40   : > { %v3806_v11 = vpack.c.b16 %v786_v62, %v785_v52  ;;  %v550_v15 = vsel %vm3650_vm4, %v545_v63, %v549_v41  ;;  %v649_v18 = vrot.slane %v647_v2, 4  ;;  %v560_v21 = vsel %vm3650_vm4, %v555_v3, %v559_v53  ;;  %v317_v41 = vld [vmem:[%s3618_s10 + $0x18] sm:$0xf]  ;;  %v3829_v52 = vld [vmem:[%s3618_s10 + $0x20] sm:$0x1] }
  0x41   : > { %v795_v22 = vunpack.c.l.b16 %v550_v15  ;;  %v640_v23 = vor.u32 %v639_v6, %v636_v0  ;;  %v655_v24 = vrot.slane %v653_v9, 5  ;;  %v796_v25 = vunpack.c.l.b16 %v560_v21  ;;  %v327_v6 = vld [vmem:[%s3618_s10 + $0x54] sm:$0xf] }
  0x42   : > { %3026 = vmatmul.msk.bf16.gmra.mxu0 %vm846_vm3, %v3806_v11  ;;  %v650_v29 = vor.u32 %v649_v18, %v645_v7  ;;  %v733_v14 = vshll.u32 %v341_v10, 16  ;;  %v739_v32 = vshll.u32 %v3811_v19, 16  ;;  %v743_v33 = vshrl.u32 %v3811_v19, 16  ;;  %v3842_v18 = vld [vmem:[%s3618_s10 + $0x58] sm:$0xf] }
  0x43   : > { %v641_v31 = vrot.slane %v640_v23, 4  ;;  %v749_v34 = vshll.u32 %v363_v20, 16  ;;  %v3820_v35 = vpack.c.b16 %v796_v25, %v795_v22  ;;  %v732_v37 = vrot.slane %v730_v30, 4  ;;  %v3389_v20 = vld [vmem:[%s4830_s1 + $0x50] sm:$0xff]  ;;  %v3850_v25 = vld [vmem:[%s3618_s10 + $0x5c] sm:$0x1] }
  0x44   : > { %v651_v36 = vrot.slane %v650_v29, 4  ;;  %v735_v38 = vrot.slane %v733_v14, 5  ;;  %v741_v47 = vrot.slane %v739_v32, 5  ;;  %v745_v49 = vrot.slane %v743_v33, 4  ;;  %1825 = vmatpush.bf16.msrb.mxu0 %v3389_v20 }
  0x45   : > { %4865 = vst [vmem:[#allocation6_spill] sm:$0xff] %v3820_v35  ;;  %v646_v43 = vsel %vm3650_vm4, %v641_v31, %v645_v7  ;;  %3031 = vmatmul.msk.bf16.gmra.mxu1 %vm846_vm3, %v3820_v35  ;;  %v751_v57 = vrot.slane %v749_v34, 5  ;;  %v442_v61 = vshrl.u32 %v317_v41, 16  ;;  %v445_v62 = vshll.u32 %v317_v41, 16 }
  0x46   : > { %v656_v46 = vsel %vm3650_vm4, %v651_v36, %v655_v24  ;;  %v803_v53 = vunpack.c.l.b16 %v646_v43  ;;  %v736_v55 = vor.u32 %v735_v38, %v732_v37  ;;  %v746_v60 = vor.u32 %v745_v49, %v741_v47  ;;  %v335_v37 = vld [vmem:[%s3618_s10 + $0x84] sm:$0xf] }
  0x47   : > { %v804_v58 = vunpack.c.l.b16 %v656_v46  ;;  %v451_v0 = vshll.u32 %v3826_v51, 16  ;;  %v455_v2 = vshrl.u32 %v3826_v51, 16  ;;  %v461_v3 = vshll.u32 %v3829_v52, 16 }
  0x48   : > { %v737_v63 = vrot.slane %v736_v55, 4  ;;  %v747_v9 = vrot.slane %v746_v60, 4  ;;  %v444_v10 = vrot.slane %v442_v61, 4  ;;  %v447_v15 = vrot.slane %v445_v62, 5  ;;  %v3868_v62 = vld [vmem:[%s3618_s10 + $0x8c] sm:$0x1] }
  0x49   : > { %v3839_v7 = vpack.c.b16 %v804_v58, %v803_v53  ;;  %v453_v22 = vrot.slane %v451_v0, 5  ;;  %v457_v23 = vrot.slane %v455_v2, 4  ;;  %v463_v24 = vrot.slane %v461_v3, 5 }
  0x4a   : > { %v742_v21 = vsel %vm3650_vm4, %v737_v63, %v741_v47  ;;  %v752_v29 = vsel %vm3650_vm4, %v747_v9, %v751_v57  ;;  %v448_v14 = vor.u32 %v447_v15, %v444_v10  ;;  %v562_v31 = vshrl.u32 %v327_v6, 16  ;;  %v3863_v57 = vld [vmem:[%s3618_s10 + $0x88] sm:$0xf] }
  0x4b   : > { %3035 = vmatmul.msk.bf16.gmra.mxu2 %vm846_vm3, %v3839_v7  ;;  %v811_v30 = vunpack.c.l.b16 %v742_v21  ;;  %v812_v32 = vunpack.c.l.b16 %v752_v29  ;;  %v458_v33 = vor.u32 %v457_v23, %v453_v22  ;;  %v565_v34 = vshll.u32 %v327_v6, 16 }
  0x4c   : > { %v571_v36 = vshll.u32 %v3842_v18, 16  ;;  %v449_v38 = vrot.slane %v448_v14, 4  ;;  %v564_v41 = vrot.slane %v562_v31, 4  ;;  %v575_v43 = vshrl.u32 %v3842_v18, 16 }
  0x4d   : > { %v581_v47 = vshll.u32 %v3850_v25, 16  ;;  %v3860_v49 = vpack.c.b16 %v812_v32, %v811_v30  ;;  %v459_v46 = vrot.slane %v458_v33, 4  ;;  %v567_v53 = vrot.slane %v565_v34, 5  ;;  %v343_v30 = vld [vmem:[%s3618_s10 + $0xb4] sm:$0xf] }
  0x4e   : > { %v573_v55 = vrot.slane %v571_v36, 5  ;;  %v454_v58 = vsel %vm3650_vm4, %v449_v38, %v453_v22  ;;  %v577_v60 = vrot.slane %v575_v43, 4  ;;  %v658_v63 = vshrl.u32 %v335_v37, 16  ;;  %v3881_v32 = vld [vmem:[%s3618_s10 + $0xb8] sm:$0xf] }
  0x4f   : > { %4866 = vst [vmem:[#allocation7_spill] sm:$0xff] %v3860_v49  ;;  %v583_v61 = vrot.slane %v581_v47, 5  ;;  %3039 = vmatmul.msk.bf16.gmra.mxu3 %vm846_vm3, %v3860_v49  ;;  %v464_v0 = vsel %vm3650_vm4, %v459_v46, %v463_v24  ;;  %v787_v2 = vunpack.c.l.b16 %v454_v58  ;;  %v568_v3 = vor.u32 %v567_v53, %v564_v41  ;;  %v3886_v38 = vld [vmem:[%s3618_s10 + $0xbc] sm:$0x1] }
  0x50   : > { %v661_v6 = vshll.u32 %v335_v37, 16  ;;  %v788_v9 = vunpack.c.l.b16 %v464_v0  ;;  %v578_v10 = vor.u32 %v577_v60, %v573_v55  ;;  %v660_v15 = vrot.slane %v658_v63, 4 }
  0x51   : > { %v667_v20 = vshll.u32 %v3863_v57, 16  ;;  %v569_v21 = vrot.slane %v568_v3, 4  ;;  %v671_v23 = vshrl.u32 %v3863_v57, 16  ;;  %v677_v29 = vshll.u32 %v3868_v62, 16 }
  0x52   : > { %v663_v22 = vrot.slane %v661_v6, 5  ;;  %v3878_v14 = vpack.c.b16 %v788_v9, %v787_v2  ;;  %v579_v24 = vrot.slane %v578_v10, 4  ;;  %v754_v47 = vshrl.u32 %v343_v30, 16  ;;  %v319_v6 = vld [vmem:[%s3618_s10 + $0x24] sm:$0xf] }
  0x53   : > { %v669_v31 = vrot.slane %v667_v20, 5  ;;  %v574_v33 = vsel %vm3650_vm4, %v569_v21, %v573_v55  ;;  %v673_v36 = vrot.slane %v671_v23, 4  ;;  %v679_v37 = vrot.slane %v677_v29, 5  ;;  %v3901_v20 = vld [vmem:[%s3618_s10 + $0x28] sm:$0xf] }
  0x54   : > { %v664_v34 = vor.u32 %v663_v22, %v660_v15  ;;  %3027 = vmatmul.msk.bf16.gmra.mxu0 %vm846_vm3, %v3878_v14  ;;  %v584_v41 = vsel %vm3650_vm4, %v579_v24, %v583_v61  ;;  %v797_v43 = vunpack.c.l.b16 %v574_v33  ;;  %v757_v46 = vshll.u32 %v343_v30, 16  ;;  %v3905_v30 = vld [vmem:[%s3618_s10 + $0x2c] sm:$0x1] }
  0x55   : > { %v798_v53 = vunpack.c.l.b16 %v584_v41  ;;  %v674_v60 = vor.u32 %v673_v36, %v669_v31  ;;  %v763_v55 = vshll.u32 %v3881_v32, 16  ;;  %v756_v63 = vrot.slane %v754_v47, 4 }
  0x56   : > { %v665_v58 = vrot.slane %v664_v34, 4  ;;  %v759_v0 = vrot.slane %v757_v46, 5  ;;  %v767_v2 = vshrl.u32 %v3881_v32, 16  ;;  %v773_v3 = vshll.u32 %v3886_v38, 16 }
  0x57   : > { %v3896_v9 = vpack.c.b16 %v798_v53, %v797_v43  ;;  %v675_v10 = vrot.slane %v674_v60, 4  ;;  %v765_v15 = vrot.slane %v763_v55, 5  ;;  %v1263_v21 = vrot.slane %v3672_v17, 5  ;;  %v367_v60 = vld [vmem:[%s3618_s10] sm:$0xe] }
  0x58   : > { %v670_v61 = vsel %vm3650_vm4, %v665_v58, %v669_v31  ;;  %v760_v23 = vor.u32 %v759_v0, %v756_v63  ;;  %v769_v29 = vrot.slane %v767_v2, 4  ;;  %v775_v33 = vrot.slane %v773_v3, 5  ;;  %v3270_v2 = vld [vmem:[%s4830_s1 + $0x88] sm:$0x3]  ;;  %v3303_v3 = vld [vmem:[%s4830_s1 + $0x9c] sm:$0x3] }
  0x59   : > { %4867 = vst [vmem:[#allocation8_spill] sm:$0xff] %v3896_v9  ;;  %v805_v22 = vunpack.c.l.b16 %v670_v61  ;;  %3032 = vmatmul.msk.bf16.gmra.mxu1 %vm846_vm3, %v3896_v9  ;;  %v680_v24 = vsel %vm3650_vm4, %v675_v10, %v679_v37  ;;  %v466_v31 = vshrl.u32 %v319_v6, 16  ;;  %v469_v34 = vshll.u32 %v319_v6, 16 }
  0x5a   : > { %v806_v36 = vunpack.c.l.b16 %v680_v24  ;;  %v761_v41 = vrot.slane %v760_v23, 4  ;;  %v770_v43 = vor.u32 %v769_v29, %v765_v15  ;;  %v475_v17 = vshll.u32 %v3901_v20, 16 }
  0x5b   : > { %v468_v47 = vrot.slane %v466_v31, 4  ;;  %v471_v46 = vrot.slane %v469_v34, 5  ;;  %v479_v53 = vshrl.u32 %v3901_v20, 16  ;;  %v485_v58 = vshll.u32 %v3905_v30, 16 }
  0x5c   : > { %v3915_v55 = vpack.c.b16 %v806_v36, %v805_v22  ;;  %v766_v37 = vsel %vm3650_vm4, %v761_v41, %v765_v15  ;;  %v771_v63 = vrot.slane %v770_v43, 4  ;;  %v477_v0 = vrot.slane %v475_v17, 5  ;;  %v3241_v22 = vld [vmem:[%s4830_s1 + $0x74] sm:$0x3]  ;;  %v3333_v15 = vld [vmem:[%s4830_s1 + $0xb0] sm:$0x3] }
  0x5d   : > { %v813_v6 = vunpack.c.l.b16 %v766_v37  ;;  %v472_v61 = vor.u32 %v471_v46, %v468_v47  ;;  %v481_v10 = vrot.slane %v479_v53, 4  ;;  %v487_v23 = vrot.slane %v485_v58, 5 }
  0x5e   : > { %3036 = vmatmul.msk.bf16.gmra.mxu2 %vm846_vm3, %v3915_v55  ;;  %v776_v29 = vsel %vm3650_vm4, %v771_v63, %v775_v33  ;;  %v3129_v24 = vrot.slane %v367_v60, 9  ;;  %v1260_v43 = vrot.slane %v3667_v8, 5  ;;  %v2119_v17 = vunpack.c.l.b16 %v3270_v2 }
  0x5f   : > { %v814_v31 = vunpack.c.l.b16 %v776_v29  ;;  %v473_v34 = vrot.slane %v472_v61, 4  ;;  %v482_v36 = vor.u32 %v481_v10, %v477_v0  ;;  %v2294_v47 = vunpack.c.l.b16 %v3303_v3 }
  0x60   : > { %v1966_v46 = vunpack.c.l.b16 %v3241_v22  ;;  %v2454_v53 = vunpack.c.l.b16 %v3333_v15  ;;  %v1261_v37 = vsel %vm3935_vm7, %v3129_v24, %v1260_v43  ;;  %v1262_v61 = vrot.slane %v1260_v43, 4  ;;  %v3363_v24 = vld [vmem:[%s3618_s10] sm:$0xff] }
  0x61   : > { %v3940_v58 = vpack.c.b16 %v814_v31, %v813_v6  ;;  %v478_v33 = vsel %vm3650_vm4, %v473_v34, %v477_v0  ;;  %v483_v60 = vrot.slane %v482_v36, 4  ;;  %v1376_v10 = vunpack.c.l.b16 %v1261_v37 }
  0x62   : > { %v789_v63 = vunpack.c.l.b16 %v478_v33  ;;  %v2122_v29 = vpack.c.b16 %v2119_v17, %v2119_v17  ;;  %v2297_v2 = vpack.c.b16 %v2294_v47, %v2294_v47  ;;  %v1969_v3 = vpack.c.b16 %v1966_v46, %v1966_v46  ;;  %v368_v47 = vld [vmem:[%s3618_s10 + $0xc] sm:$0xe] }
  0x63   : > { %3040 = vmatmul.msk.bf16.gmra.mxu3 %vm846_vm3, %v3940_v58  ;;  %v488_v8 = vsel %vm3650_vm4, %v483_v60, %v487_v23  ;;  %v2457_v6 = vpack.c.b16 %v2454_v53, %v2454_v53  ;;  %v1264_v0 = vsel %vm3935_vm7, %v1262_v61, %v1263_v21  ;;  %v1267_v21 = vrot.slane %v3746_v26, 5  ;;  %v3364_v46 = vld [vmem:[%s3618_s10 + $0xc] sm:$0xff] }
  0x64   : > { %v790_v22 = vunpack.c.l.b16 %v488_v8  ;;  %v2129_v15 = vsel %vm895_vm0, %v2122_v29, 0  ;;  %v1377_v31 = vunpack.c.l.b16 %v1264_v0  ;;  %v2304_v34 = vsel %vm895_vm0, %v2297_v2, 0  ;;  %v3982_v8 = vld [vmem:[%s3618_s10 + $0x18] sm:$0xff] }
  0x65   : > { %2136 = vmatpush.bf16.msra.mxu2 %v2129_v15  ;;  %v1976_v36 = vsel %vm895_vm0, %v1969_v3, 0  ;;  %v2464_v23 = vsel %vm895_vm0, %v2457_v6, 0  ;;  %2311 = vmatpush.bf16.msra.mxu3 %v2304_v34  ;;  %v3130_v53 = vrot.slane %v368_v47, 9  ;;  %v1269_v33 = vrot.slane %v1267_v21, 4 }
  0x66   : > { %v3957_v43 = vpack.c.b16 %v790_v22, %v789_v63  ;;  %1983 = vmatpush.bf16.msra.mxu1 %v1976_v36  ;;  %v1408_v17 = vpack.c.b16 %v1377_v31, %v1376_v10  ;;  %2471 = vmatpush.bf16.msra.mxu0 %v2464_v23  ;;  %v1270_v60 = vrot.slane %v3751_v56, 5  ;;  %v1274_v29 = vrot.slane %v3826_v51, 5  ;;  %v369_v56 = vld [vmem:[%s3618_s10 + $0x18] sm:$0xe]  ;;  %v4002_v31 = vld [vmem:[%s3618_s10 + $0x24] sm:$0xff] }
  0x67   : > { %v1268_v37 = vsel %vm3935_vm7, %v3130_v53, %v1267_v21  ;;  %v3131_v2 = vrot.slane %v369_v56, 9  ;;  %v1277_v6 = vrot.slane %v3829_v52, 5  ;;  %v1281_v52 = vrot.slane %v3901_v20, 5 }
  0x68   : > { %3028 = vmatmul.msk.bf16.gmra.mxu0 %vm846_vm3, %v3957_v43  ;;  %v1271_v63 = vsel %vm3935_vm7, %v1269_v33, %v1270_v60  ;;  %v1378_v61 = vunpack.c.l.b16 %v1268_v37  ;;  %v1276_v3 = vrot.slane %v1274_v29, 4  ;;  %v1284_v23 = vrot.slane %v3905_v30, 5  ;;  %v371_v33 = vld [vmem:[%s3618_s10 + $0x30] sm:$0xe] }
  0x69   : > { %3113 = vmatmul.msk.bf16.vlgmr.msrb.gmra.mxu1 %vm846_vm3, %v3363_v24  ;;  %v1379_v26 = vunpack.c.l.b16 %v1271_v63  ;;  %v370_v24 = vld [vmem:[%s3618_s10 + $0x24] sm:$0xe]  ;;  %v1283_v36 = vrot.slane %v1281_v52, 4  ;;  %v1288_v53 = vrot.slane %v3627_v12, 5  ;;  %v4024_v60 = vld [vmem:[%s3618_s10 + $0x30] sm:$0xff]  ;;  %v3133_v37 = vrot.slane %v371_v33, 9 }
  0x6a   : > { %v1278_v51 = vsel %vm3935_vm7, %v1276_v3, %v1277_v6  ;;  %v3132_v34 = vrot.slane %v370_v24, 9  ;;  %v3396_v6 = vld [vmem:[%s4830_s1 + $0x94] sm:$0xff]  ;;  %v372_v24 = vld [vmem:[%s3618_s10 + $0x3c] sm:$0xe] }
  0x6b   : > { %v3975_v10 = vpack.c.b16 %v1379_v26, %v1378_v61  ;;  %v1381_v0 = vunpack.c.l.b16 %v1278_v51  ;;  %v1285_v20 = vsel %vm3935_vm7, %v1283_v36, %v1284_v23  ;;  %v1290_v63 = vrot.slane %v1288_v53, 4  ;;  %2312 = vmatpush.bf16.msra.mxu3 %v3396_v6  ;;  %v4098_v6 = vld [vmem:[%s3618_s10 + $0x48] sm:$0xff] }
  0x6c   : > { %v1383_v47 = vunpack.c.l.b16 %v1285_v20  ;;  %v1291_v61 = vrot.slane %v3630_v13, 5  ;;  %v1289_v26 = vsel %vm3935_vm7, %v3133_v37, %v1288_v53  ;;  %v3394_v13 = vld [vmem:[%s4830_s1 + $0x80] sm:$0xff]  ;;  %v3134_v23 = vrot.slane %v372_v24, 9  ;;  %v3398_v53 = vld [vmem:[%s4830_s1 + $0xa8] sm:$0xff]  ;;  %4874 = vst [vmem:[#allocation13_spill] sm:$0xff] %v4098_v6 }
  0x6d   : > { %v1384_v56 = vunpack.c.l.b16 %v1289_v26  ;;  %2137 = vmatpush.bf16.msra.mxu2 %v3394_v13  ;;  %v1298_v20 = vrot.slane %v3697_v40, 5  ;;  %2472 = vmatpush.bf16.msra.mxu0 %v3398_v53 }
  0x6e   : > { %3158 = vmatmul.msk.bf16.vlgmr.msrb.gmra.mxu2 %vm846_vm3, %v1408_v17  ;;  %v1282_v17 = vsel %vm3935_vm7, %v3132_v34, %v1281_v52  ;;  %v1295_v52 = vrot.slane %v3694_v39, 5  ;;  %v4061_v34 = vld [vmem:[%s3618_s10 + $0x3c] sm:$0xff] }
  0x6f   : > { %v1382_v21 = vunpack.c.l.b16 %v1282_v17  ;;  %4871 = vst [vmem:[#allocation10_spill] sm:$0xff] %v4061_v34 }
  0x70   : > { %v1297_v17 = vrot.slane %v1295_v52, 4  ;;  %v1296_v39 = vsel %vm3935_vm7, %v3134_v23, %v1295_v52  ;;  %v1305_v23 = vrot.slane %v3778_v28, 5 }
  0x71   : > { %v1386_v37 = vunpack.c.l.b16 %v1296_v39 }
  0x73   : > { %3191 = vmatmul.msk.bf16.vlgmr.msrb.gmra.mxu3 %vm846_vm3, %v3364_v46 }
  0x78   : > { %3220 = vmatmul.msk.bf16.vlgmr.msrb.gmra.mxu0 %vm846_vm3, %v3806_v11  ;;  %v1275_v11 = vsel %vm3935_vm7, %v3131_v2, %v1274_v29  ;;  %v1292_v29 = vsel %vm3935_vm7, %v1290_v63, %v1291_v61 }
  0x79   : > { %3114 = vmatmul.msk.bf16.gmra.mxu1 %vm846_vm3, %v3364_v46  ;;  %v1380_v22 = vunpack.c.l.b16 %v1275_v11  ;;  %v4015_v46 = vpack.c.b16 %v1383_v47, %v1382_v21  ;;  %v1385_v2 = vunpack.c.l.b16 %v1292_v29  ;;  %v3392_v11 = vld [vmem:[%s4830_s1 + $0x6c] sm:$0xff]  ;;  %v1299_v47 = vsel %vm3935_vm7, %v1297_v17, %v1298_v20 }
  0x7a   : > { %1984 = vmatpush.bf16.msra.mxu1 %v3392_v11  ;;  %v1387_v63 = vunpack.c.l.b16 %v1299_v47 }
  0x7b   : > { %v3995_v15 = vpack.c.b16 %v1381_v0, %v1380_v22  ;;  %v4052_v22 = vpack.c.b16 %v1385_v2, %v1384_v56  ;;  %v1302_v56 = vrot.slane %v3760_v4, 5  ;;  %v373_v2 = vld [vmem:[%s3618_s10 + $0x48] sm:$0xe] }
  0x7c   : > { %v4087_v26 = vpack.c.b16 %v1387_v63, %v1386_v37  ;;  %v3135_v52 = vrot.slane %v373_v2, 9  ;;  %v1309_v2 = vrot.slane %v3842_v18, 5 }
  0x7d   : > { %v1304_v24 = vrot.slane %v1302_v56, 4 }
  0x7e   : > { %3159 = vmatmul.msk.bf16.gmra.mxu2 %vm846_vm3, %v3975_v10  ;;  %4873 = vst [vmem:[#allocation12_spill] sm:$0xff] %v4087_v26  ;;  %v1303_v20 = vsel %vm3935_vm7, %v3135_v52, %v1302_v56  ;;  %v374_v52 = vld [vmem:[%s3618_s10 + $0x54] sm:$0xe] }
  0x7f   : > { %v1306_v39 = vsel %vm3935_vm7, %v1304_v24, %v1305_v23  ;;  %v1388_v47 = vunpack.c.l.b16 %v1303_v20  ;;  %v4132_v23 = vld [vmem:[%s3618_s10 + $0x54] sm:$0xff]  ;;  %v3136_v20 = vrot.slane %v374_v52, 9 }
  0x80   : > { %v1389_v53 = vunpack.c.l.b16 %v1306_v39  ;;  %4878 = vst [vmem:[#allocation17_spill] sm:$0xff] %v4132_v23  ;;  %v1311_v39 = vrot.slane %v1309_v2, 4 }
  0x81   : > { %v1310_v18 = vsel %vm3935_vm7, %v3136_v20, %v1309_v2  ;;  %v3516_v20 = vld [vmem:[%s3618_s10 + $0x64] sm:$0xf] }
  0x82   : > { %v4121_v63 = vpack.c.b16 %v1389_v53, %v1388_v47 }
  0x83   : > { %3192 = vmatmul.msk.bf16.gmra.mxu3 %vm846_vm3, %v3982_v8 }
  0x84   : > { %4877 = vst [vmem:[#allocation16_spill] sm:$0xff] %v4121_v63 }
  0x88   : > { %3221 = vmatmul.msk.bf16.gmra.mxu0 %vm846_vm3, %v3878_v14 }
  0x89   : > { %3115 = vmatmul.msk.bf16.gmra.mxu1 %vm846_vm3, %v3982_v8 }
  0x8e   : > { %3160 = vmatmul.msk.bf16.gmra.mxu2 %vm846_vm3, %v3995_v15 }
  0x93   : > { %3193 = vmatmul.msk.bf16.gmra.mxu3 %vm846_vm3, %v4002_v31 }
  0x98   : > { %3222 = vmatmul.msk.bf16.gmra.mxu0 %vm846_vm3, %v3957_v43 }
  0x99   : > { %3116 = vmatmul.msk.bf16.gmra.mxu1 %vm846_vm3, %v4002_v31 }
  0x9d   : > { %v4017_v30 = vpop.f32.mrf.mxu1 }
  0x9e   : > { %3161 = vmatmul.msk.bf16.gmra.mxu2 %vm846_vm3, %v4015_v46 }
  0xa3   : > { %3194 = vmatmul.msk.bf16.gmra.mxu3 %vm846_vm3, %v4024_v60 }
  0xa5   : > { %v4033_v12 = vpop.f32.mrf.mxu1 }
  0xa7   : > { %v4035_v3 = vpop.f32.mrf.mxu2 }
  0xa8   : > { %3223 = vmatmul.msk.bf16.gmra.mxu0 %vm846_vm3, %v3662_v5 }
  0xa9   : > { %3117 = vmatmul.msk.bf16.gmra.mxu1 %vm846_vm3, %v4024_v60 }
  0xab   : > { %v4050_v51 = vpop.f32.mrf.mxu0  ;;  %v4054_v0 = vpop.f32.mrf.mxu3 }
  0xac   : > { %4870 = vst [vmem:[#allocation9_spill] sm:$0xff] %v4054_v0 }
  0xae   : > { %3162 = vmatmul.msk.bf16.gmra.mxu2 %vm846_vm3, %v4052_v22 }
  0xaf   : > { %v4066_v21 = vpop.f32.mrf.mxu2 }
  0xb0   : > { %v4063_v36 = vpop.f32.mrf.mxu1 }
  0xb3   : > { %3195 = vmatmul.msk.bf16.gmra.mxu3 %vm846_vm3, %v4061_v34  ;;  %v4077_v33 = vpop.f32.mrf.mxu0  ;;  %v4079_v40 = vpop.f32.mrf.mxu3 }
  0xb4   : > { %4872 = vst [vmem:[#allocation11_spill] sm:$0xff] %v4079_v40  ;;  %v1390_v40 = vunpack.c.l.b16 %v1310_v18 }
  0xb8   : > { %3224 = vmatmul.msk.bf16.gmra.mxu0 %vm846_vm3, %v3743_v50  ;;  %v4083_v61 = vpop.f32.mrf.mxu1 }
  0xb9   : > { %3118 = vmatmul.msk.bf16.gmra.mxu1 %vm846_vm3, %v4061_v34 }
  0xbb   : > { %v4089_v29 = vpop.f32.mrf.mxu2 }
  0xbe   : > { %3163 = vmatmul.msk.bf16.gmra.mxu2 %vm846_vm3, %v4087_v26 }
  0xbf   : > { %v4093_v13 = vpop.f32.mrf.mxu0 }
  0xc0   : > { %v4100_v11 = vpop.f32.mrf.mxu3 }
  0xc1   : > { %4875 = vst [vmem:[#allocation14_spill] sm:$0xff] %v4100_v11 }
  0xc2   : > { %v4103_v17 = vpop.f32.mrf.mxu1 }
  0xc3   : > { %3196 = vmatmul.msk.bf16.gmra.mxu3 %vm846_vm3, %v4098_v6  ;;  %v4107_v4 = vpop.f32.mrf.mxu2 }
  0xc7   : > { %v4113_v37 = vpop.f32.mrf.mxu0 }
  0xc8   : > { %3225 = vmatmul.msk.bf16.gmra.mxu0 %vm846_vm3, %v3820_v35  ;;  %v4117_v28 = vpop.f32.mrf.mxu3  ;;  %v1316_v35 = vrot.slane %v3516_v20, 5 }
  0xc9   : > { %4876 = vst [vmem:[#allocation15_spill] sm:$0xff] %v4117_v28  ;;  %3119 = vmatmul.msk.bf16.gmra.mxu1 %vm846_vm3, %v4098_v6  ;;  %v1312_v28 = vrot.slane %v3850_v25, 5 }
  0xca   : > { %v4124_v56 = vpop.f32.mrf.mxu1 }
  0xcb   : > { %v1313_v53 = vsel %vm3935_vm7, %v1311_v39, %v1312_v28  ;;  %v375_v39 = vld [vmem:[%s3618_s10 + $0x60] sm:$0xe] }
  0xcc   : > { %v1391_v25 = vunpack.c.l.b16 %v1313_v53  ;;  %v3517_v53 = vld [vmem:[%s3618_s10 + $0x68] sm:$0x1]  ;;  %v3137_v6 = vrot.slane %v375_v39, 9 }
  0xcd   : > { %v1319_v0 = vrot.slane %v3517_v53, 5 }
  0xce   : > { %v4127_v24 = vpop.f32.mrf.mxu2  ;;  %3164 = vmatmul.msk.bf16.gmra.mxu2 %vm846_vm3, %v4121_v63 }
  0xd1   : > { %v4135_v11 = vpop.f32.mrf.mxu0 }
  0xd2   : > { %v4137_v47 = vpop.f32.mrf.mxu3 }
  0xd3   : > { %4879 = vst [vmem:[#allocation18_spill] sm:$0xff] %v4137_v47  ;;  %3197 = vmatmul.msk.bf16.gmra.mxu3 %vm846_vm3, %v4132_v23  ;;  %v4153_v47 = vpack.c.b16 %v1391_v25, %v1390_v40  ;;  %v1317_v25 = vsel %vm3935_vm7, %v3137_v6, %v1316_v35  ;;  %v376_v6 = vld [vmem:[%s3618_s10 + $0x6c] sm:$0xe] }
  0xd4   : > { %v1392_v39 = vunpack.c.l.b16 %v1317_v25  ;;  %v1326_v25 = vrot.slane %v3724_v1, 5 }
  0xd5   : > { %4881 = vst [vmem:[#allocation20_spill] sm:$0xff] %v4153_v47 }
  0xd6   : > { %v4145_v52 = vpop.f32.mrf.mxu1  ;;  %v4147_v63 = vpop.f32.mrf.mxu2 }
  0xd7   : > { %4880 = vst [vmem:[#allocation19_spill] sm:$0xff] %v4147_v63 }
  0xd8   : > { %3226 = vmatmul.msk.bf16.gmra.mxu0 %vm846_vm3, %v3896_v9  ;;  %v4167_v9 = vld [vmem:[%s3618_s10 + $0x60] sm:$0xff] }
  0xd9   : > { %3120 = vmatmul.msk.bf16.gmra.mxu1 %vm846_vm3, %v4132_v23  ;;  %v4155_v2 = vpop.f32.mrf.mxu0  ;;  %4883 = vst [vmem:[#allocation22_spill] sm:$0xff] %v4167_v9  ;;  %v1318_v23 = vrot.slane %v1316_v35, 4 }
  0xda   : > { %v4158_v28 = vpop.f32.mrf.mxu3 }
  0xdb   : > { %4882 = vst [vmem:[#allocation21_spill] sm:$0xff] %v4158_v28  ;;  %v1320_v20 = vsel %vm3935_vm7, %v1318_v23, %v1319_v0  ;;  %v1323_v0 = vrot.slane %v3719_v59, 5 }
  0xdc   : > { %v1393_v26 = vunpack.c.l.b16 %v1320_v20  ;;  %v4200_v20 = vld [vmem:[%s3618_s10 + $0x6c] sm:$0xff] }
  0xde   : > { %3165 = vmatmul.msk.bf16.gmra.mxu2 %vm846_vm3, %v4153_v47  ;;  %v4163_v18 = vpop.f32.mrf.mxu1  ;;  %v4188_v35 = vpack.c.b16 %v1393_v26, %v1392_v39  ;;  %v1325_v26 = vrot.slane %v1323_v0, 4 }
  0xe0   : > { %4887 = vst [vmem:[#allocation26_spill] sm:$0xff] %v4188_v35 }
  0xe1   : > { %v4169_v40 = vpop.f32.mrf.mxu2 }
  0xe2   : > { %4884 = vst [vmem:[#allocation23_spill] sm:$0xff] %v4169_v40 }
  0xe3   : > { %3198 = vmatmul.msk.bf16.gmra.mxu3 %vm846_vm3, %v4167_v9 }
  0xe5   : > { %v4177_v28 = vpop.f32.mrf.mxu0 }
  0xe6   : > { %v4179_v47 = vpop.f32.mrf.mxu3  ;;  %v1143_v53 = vpop.f32.mrf.mxu1 }
  0xe7   : > { %4885 = vst [vmem:[#allocation24_spill] sm:$0xff] %v4179_v47  ;;  %v1144_v50 = vadd.f32 %v1143_v53, %v4050_v51 }
  0xe8   : > { %3227 = vmatmul.msk.bf16.gmra.mxu0 %vm846_vm3, %v3680_v27  ;;  %v3138_v27 = vrot.slane %v376_v6, 9 }
  0xe9   : > { %v4184_v40 = vpop.f32.mrf.mxu2  ;;  %3121 = vmatmul.msk.bf16.gmra.mxu1 %vm846_vm3, %v4167_v9 }
  0xea   : > { %4886 = vst [vmem:[#allocation25_spill] sm:$0xff] %v4184_v40  ;;  %v1324_v59 = vsel %vm3935_vm7, %v3138_v27, %v1323_v0 }
  0xeb   : > { %v1394_v34 = vunpack.c.l.b16 %v1324_v59  ;;  %v4224_v59 = vld [vmem:[%s3618_s10 + $0x78] sm:$0xff] }
  0xed   : > { %v4192_v23 = vpop.f32.mrf.mxu0 }
  0xee   : > { %v4194_v47 = vpop.f32.mrf.mxu3  ;;  %3166 = vmatmul.msk.bf16.gmra.mxu2 %vm846_vm3, %v4188_v35  ;;  %v1145_v51 = vpop.f32.mrf.mxu1 }
  0xef   : > { %4888 = vst [vmem:[#allocation27_spill] sm:$0xff] %v4194_v47  ;;  %v1146_v53 = vadd.f32 %v1145_v51, %v4077_v33  ;;  %v1327_v47 = vsel %vm3935_vm7, %v1325_v26, %v1326_v25  ;;  %v1330_v25 = vrot.slane %v3789_v44, 5  ;;  %v377_v26 = vld [vmem:[%s3618_s10 + $0x78] sm:$0xe] }
  0xf0   : > { %v1395_v63 = vunpack.c.l.b16 %v1327_v47  ;;  %v3393_v44 = vld [vmem:[%s4830_s1 + $0x78] sm:$0xff] }
  0xf1   : > { %v1499_v39 = vpop.f32.mrf.mxu2  ;;  %2138 = vmatpush.bf16.msra.mxu2 %v3393_v44 }
  0xf2   : > { %v1579_v9 = vadd.f32 %v1499_v39, %v1144_v50  ;;  %v4216_v51 = vpack.c.b16 %v1395_v63, %v1394_v34 }
  0xf3   : > { %3199 = vmatmul.msk.bf16.gmra.mxu3 %vm846_vm3, %v4200_v20 }
  0xf5   : > { %v1827_v35 = vpop.f32.mrf.mxu0 }
  0xf6   : > { %v1652_v1 = vpop.f32.mrf.mxu3  ;;  %v1148_v40 = vpop.f32.mrf.mxu1 }
  0xf7   : > { %v1732_v33 = vadd.f32 %v1652_v1, %v1579_v9  ;;  %v1149_v6 = vadd.f32 %v1148_v40, %v4093_v13  ;;  %v1333_v9 = vrot.slane %v3796_v54, 5  ;;  %v3139_v1 = vrot.slane %v377_v26, 9  ;;  %v3395_v54 = vld [vmem:[%s4830_s1 + $0x8c] sm:$0xff]  ;;  %v3391_v26 = vld [vmem:[%s4830_s1 + $0x64] sm:$0xff] }
  0xf8   : > { %3228 = vmatmul.msk.bf16.gmra.mxu0 %vm846_vm3, %v3770_v16  ;;  %2313 = vmatpush.bf16.msra.mxu3 %v3395_v54 }
  0xf9   : > { %v1501_v50 = vpop.f32.mrf.mxu2  ;;  %3122 = vmatmul.msk.bf16.gmra.mxu1 %vm846_vm3, %v4200_v20  ;;  %v4214_v27 = vadd.f32 %v1827_v35, %v1732_v33 }
  0xfa   : > { %v1580_v0 = vadd.f32 %v1501_v50, %v1146_v53  ;;  %v1332_v53 = vrot.slane %v1330_v25, 4  ;;  %1985 = vmatpush.bf16.msra.mxu1 %v3391_v26 }
  0xfc   : > { %v1334_v50 = vsel %vm3935_vm7, %v1332_v53, %v1333_v9 }
  0xfd   : > { %v1829_v47 = vpop.f32.mrf.mxu0 }
  0xfe   : > { %v1654_v39 = vpop.f32.mrf.mxu3  ;;  %3167 = vmatmul.msk.bf16.gmra.mxu2 %vm846_vm3, %v4216_v51  ;;  %v1150_v13 = vpop.f32.mrf.mxu1 }
  0xff   : > { %v1733_v40 = vadd.f32 %v1654_v39, %v1580_v0  ;;  %v1151_v35 = vadd.f32 %v1150_v13, %v4113_v37  ;;  %v1331_v37 = vsel %vm3935_vm7, %v3139_v1, %v1330_v25  ;;  %v3397_v25 = vld [vmem:[%s4830_s1 + $0xa0] sm:$0xff] }
 0x100   : > { %2473 = vmatpush.bf16.msra.mxu0 %v3397_v25 }
 0x101   : > { %v1504_v34 = vpop.f32.mrf.mxu2  ;;  %v4233_v63 = vadd.f32 %v1829_v47, %v1733_v40  ;;  %v1396_v47 = vunpack.c.l.b16 %v1331_v37  ;;  %v1397_v40 = vunpack.c.l.b16 %v1334_v50  ;;  %v1340_v37 = vrot.slane %v3868_v62, 5 }
 0x102   : > { %v1581_v33 = vadd.f32 %v1504_v34, %v1149_v6  ;;  %v378_v34 = vld [vmem:[%s3618_s10 + $0x84] sm:$0xe] }
 0x103   : > { %3200 = vmatmul.msk.bf16.gmra.mxu3 %vm846_vm3, %v4224_v59  ;;  %v4254_v54 = vpack.c.b16 %v1397_v40, %v1396_v47 }
 0x105   : > { %v1832_v0 = vpop.f32.mrf.mxu0 }
 0x106   : > { %v1657_v39 = vpop.f32.mrf.mxu3  ;;  %v1153_v13 = vpop.f32.mrf.mxu1 }
 0x107   : > { %v1734_v6 = vadd.f32 %v1657_v39, %v1581_v33  ;;  %v1154_v44 = vadd.f32 %v1153_v13, %v4135_v11  ;;  %v1337_v11 = vrot.slane %v3863_v57, 5  ;;  %v4262_v13 = vld [vmem:[%s3618_s10 + $0x84] sm:$0xff] }
 0x108   : > { %3229 = vmatmul.msk.bf16.gmra.mxu0 %vm846_vm3, %v3839_v7 }
 0x109   : > { %v1506_v9 = vpop.f32.mrf.mxu2  ;;  %3123 = vmatmul.msk.bf16.gmra.mxu1 %vm846_vm3, %v4224_v59  ;;  %v4252_v1 = vadd.f32 %v1832_v0, %v1734_v6  ;;  %v1339_v47 = vrot.slane %v1337_v11, 4 }
 0x10a   : > { %v1582_v53 = vadd.f32 %v1506_v9, %v1151_v35  ;;  %v3140_v35 = vrot.slane %v378_v34, 9 }
 0x10b   : > { %v1341_v25 = vsel %vm3935_vm7, %v1339_v47, %v1340_v37 }
 0x10c   : > { %v1338_v62 = vsel %vm3935_vm7, %v3140_v35, %v1337_v11  ;;  %v3518_v35 = vld [vmem:[%s3618_s10 + $0x94] sm:$0xf] }
 0x10d   : > { %v1834_v33 = vpop.f32.mrf.mxu0  ;;  %v1398_v34 = vunpack.c.l.b16 %v1338_v62  ;;  %v1344_v47 = vrot.slane %v3518_v35, 5 }
 0x10e   : > { %v1659_v50 = vpop.f32.mrf.mxu3  ;;  %3168 = vmatmul.msk.bf16.gmra.mxu2 %vm846_vm3, %v4254_v54  ;;  %v1155_v26 = vpop.f32.mrf.mxu1 }
 0x10f   : > { %v1735_v39 = vadd.f32 %v1659_v50, %v1582_v53  ;;  %v1156_v0 = vadd.f32 %v1155_v26, %v4155_v2  ;;  %v1399_v50 = vunpack.c.l.b16 %v1341_v25 }
 0x111   : > { %v1509_v40 = vpop.f32.mrf.mxu2  ;;  %v4265_v6 = vadd.f32 %v1834_v33, %v1735_v39  ;;  %v4280_v39 = vpack.c.b16 %v1399_v50, %v1398_v34 }
 0x112   : > { %v1583_v57 = vadd.f32 %v1509_v40, %v1154_v44  ;;  %v379_v40 = vld [vmem:[%s3618_s10 + $0x90] sm:$0xe] }
 0x113   : > { %4889 = vst [vmem:[#allocation28_spill] sm:$0xff] %v4265_v6  ;;  %3201 = vmatmul.msk.bf16.gmra.mxu3 %vm846_vm3, %v4262_v13  ;;  %v4288_v6 = vld [vmem:[%s3618_s10 + $0x90] sm:$0xff] }
 0x114   : > { %4891 = vst [vmem:[#allocation30_spill] sm:$0xff] %v4288_v6 }
 0x115   : > { %v1837_v9 = vpop.f32.mrf.mxu0 }
 0x116   : > { %v1662_v53 = vpop.f32.mrf.mxu3  ;;  %v1158_v2 = vpop.f32.mrf.mxu1 }
 0x117   : > { %v1736_v33 = vadd.f32 %v1662_v53, %v1583_v57  ;;  %v1159_v44 = vadd.f32 %v1158_v2, %v4177_v28  ;;  %v3519_v57 = vld [vmem:[%s3618_s10 + $0x98] sm:$0x1] }
 0x118   : > { %3230 = vmatmul.msk.bf16.gmra.mxu0 %vm846_vm3, %v3915_v55  ;;  %v1347_v25 = vrot.slane %v3519_v57, 5 }
 0x119   : > { %v1511_v26 = vpop.f32.mrf.mxu2  ;;  %3124 = vmatmul.msk.bf16.gmra.mxu1 %vm846_vm3, %v4262_v13  ;;  %v4278_v11 = vadd.f32 %v1837_v9, %v1736_v33  ;;  %v3141_v33 = vrot.slane %v379_v40, 9 }
 0x11a   : > { %v1584_v37 = vadd.f32 %v1511_v26, %v1156_v0  ;;  %v1346_v0 = vrot.slane %v1344_v47, 4 }
 0x11b   : > { %4890 = vst [vmem:[#allocation29_spill] sm:$0xff] %v4278_v11  ;;  %v1345_v35 = vsel %vm3935_vm7, %v3141_v33, %v1344_v47  ;;  %v4313_v11 = vld [vmem:[%s3618_s10 + $0x9c] sm:$0xff] }
 0x11c   : > { %v1400_v40 = vunpack.c.l.b16 %v1345_v35 }
 0x11d   : > { %v1839_v62 = vpop.f32.mrf.mxu0 }
 0x11e   : > { %v1664_v28 = vpop.f32.mrf.mxu3  ;;  %3169 = vmatmul.msk.bf16.gmra.mxu2 %vm846_vm3, %v4280_v39  ;;  %v1160_v53 = vpop.f32.mrf.mxu1 }
 0x11f   : > { %v1737_v2 = vadd.f32 %v1664_v28, %v1584_v37  ;;  %v1161_v9 = vadd.f32 %v1160_v53, %v4192_v23  ;;  %v1348_v37 = vsel %vm3935_vm7, %v1346_v0, %v1347_v25  ;;  %v3520_v25 = vld [vmem:[%s3618_s10 + $0xa0] sm:$0xf] }
 0x120   : > { %v1401_v53 = vunpack.c.l.b16 %v1348_v37  ;;  %v1351_v0 = vrot.slane %v3520_v25, 5  ;;  %v3521_v37 = vld [vmem:[%s3618_s10 + $0xa4] sm:$0x1] }
 0x121   : > { %v1514_v34 = vpop.f32.mrf.mxu2  ;;  %v4291_v50 = vadd.f32 %v1839_v62, %v1737_v2 }
 0x122   : > { %v1585_v26 = vadd.f32 %v1514_v34, %v1159_v44  ;;  %v4305_v33 = vpack.c.b16 %v1401_v53, %v1400_v40  ;;  %v380_v34 = vld [vmem:[%s3618_s10 + $0x9c] sm:$0xe] }
 0x123   : > { %4892 = vst [vmem:[#allocation31_spill] sm:$0xff] %v4291_v50  ;;  %3202 = vmatmul.msk.bf16.gmra.mxu3 %vm846_vm3, %v4288_v6 }
 0x125   : > { %v1842_v57 = vpop.f32.mrf.mxu0 }
 0x126   : > { %v1667_v28 = vpop.f32.mrf.mxu3  ;;  %v1163_v23 = vpop.f32.mrf.mxu1 }
 0x127   : > { %v1738_v62 = vadd.f32 %v1667_v28, %v1585_v26  ;;  %v1354_v28 = vrot.slane %v3521_v37, 5 }
 0x128   : > { %3231 = vmatmul.msk.bf16.gmra.mxu0 %vm846_vm3, %v3705_v48 }
 0x129   : > { %v1516_v44 = vpop.f32.mrf.mxu2  ;;  %3125 = vmatmul.msk.bf16.gmra.mxu1 %vm846_vm3, %v4288_v6  ;;  %v4303_v47 = vadd.f32 %v1842_v57, %v1738_v62  ;;  %v3142_v6 = vrot.slane %v380_v34, 9  ;;  %v1353_v57 = vrot.slane %v1351_v0, 4 }
 0x12a   : > { %v1586_v2 = vadd.f32 %v1516_v44, %v1161_v9  ;;  %v1164_v9 = vadd.f32 %v1163_v23, %v4017_v30 }
 0x12b   : > { %v1352_v44 = vsel %vm3935_vm7, %v3142_v6, %v1351_v0 }
 0x12c   : > { %v1402_v37 = vunpack.c.l.b16 %v1352_v44 }
 0x12d   : > { %v1844_v35 = vpop.f32.mrf.mxu0 }
 0x12e   : > { %v1669_v50 = vpop.f32.mrf.mxu3  ;;  %3170 = vmatmul.msk.bf16.gmra.mxu2 %vm846_vm3, %v4305_v33  ;;  %v1165_v26 = vpop.f32.mrf.mxu1 }
 0x12f   : > { %v1739_v48 = vadd.f32 %v1669_v50, %v1586_v2  ;;  %v1355_v50 = vsel %vm3935_vm7, %v1353_v57, %v1354_v28  ;;  %v1358_v57 = vrot.slane %v3811_v19, 5 }
 0x130   : > { %v1403_v30 = vunpack.c.l.b16 %v1355_v50  ;;  %v3522_v50 = vld [vmem:[%s3618_s10 + $0xb0] sm:$0x1] }
 0x131   : > { %v1519_v40 = vpop.f32.mrf.mxu2  ;;  %v4316_v53 = vadd.f32 %v1844_v35, %v1739_v48  ;;  %v1166_v48 = vadd.f32 %v1165_v26, %v4033_v12  ;;  %v1361_v12 = vrot.slane %v3522_v50, 5 }
 0x132   : > { %v1587_v62 = vadd.f32 %v1519_v40, %v1164_v9  ;;  %v4331_v28 = vpack.c.b16 %v1403_v30, %v1402_v37  ;;  %v381_v9 = vld [vmem:[%s3618_s10 + $0xa8] sm:$0xe] }
 0x133   : > { %4893 = vst [vmem:[#allocation32_spill] sm:$0xff] %v4316_v53  ;;  %3203 = vmatmul.msk.bf16.gmra.mxu3 %vm846_vm3, %v4313_v11  ;;  %v3143_v53 = vrot.slane %v381_v9, 9 }
 0x134   : > { %4895 = vst [vmem:[#allocation34_spill] sm:$0xff] %v4331_v28 }
 0x135   : > { %v1847_v2 = vpop.f32.mrf.mxu0 }
 0x136   : > { %v1672_v25 = vpop.f32.mrf.mxu3  ;;  %v1168_v34 = vpop.f32.mrf.mxu1 }
 0x137   : > { %v1740_v23 = vadd.f32 %v1672_v25, %v1587_v62  ;;  %v4339_v25 = vld [vmem:[%s3618_s10 + $0xa8] sm:$0xff] }
 0x138   : > { %3232 = vmatmul.msk.bf16.gmra.mxu0 %vm846_vm3, %v3791_v45  ;;  %4896 = vst [vmem:[#allocation35_spill] sm:$0xff] %v4339_v25  ;;  %v4377_v45 = vld [vmem:[%s3618_s10 + $0xc8] sm:$0x1] }
 0x139   : > { %v1521_v35 = vpop.f32.mrf.mxu2  ;;  %3126 = vmatmul.msk.bf16.gmra.mxu1 %vm846_vm3, %v4313_v11  ;;  %v4329_v6 = vadd.f32 %v1847_v2, %v1740_v23  ;;  %v1360_v2 = vrot.slane %v1358_v57, 4  ;;  %v1169_v23 = vadd.f32 %v1168_v34, %v4063_v36 }
 0x13a   : > { %v1588_v0 = vadd.f32 %v1521_v35, %v1166_v48  ;;  %v1359_v48 = vsel %vm3935_vm7, %v3143_v53, %v1358_v57  ;;  %v345_v53 = vld [vmem:[%s3618_s10 + $0xc0] sm:$0xf] }
 0x13b   : > { %4894 = vst [vmem:[#allocation33_spill] sm:$0xff] %v4329_v6  ;;  %v1362_v35 = vsel %vm3935_vm7, %v1360_v2, %v1361_v12  ;;  %v1404_v36 = vunpack.c.l.b16 %v1359_v48  ;;  %v1765_v48 = vshrl.u32 %v345_v53, 16 }
 0x13c   : > { %v1405_v34 = vunpack.c.l.b16 %v1362_v35 }
 0x13d   : > { %v1849_v40 = vpop.f32.mrf.mxu0 }
 0x13e   : > { %v1674_v62 = vpop.f32.mrf.mxu3  ;;  %3171 = vmatmul.msk.bf16.gmra.mxu2 %vm846_vm3, %v4331_v28  ;;  %v1170_v44 = vpop.f32.mrf.mxu1  ;;  %v4358_v2 = vpack.c.b16 %v1405_v34, %v1404_v36  ;;  %v1368_v36 = vrot.slane %v3886_v38, 5 }
 0x13f   : > { %v1741_v26 = vadd.f32 %v1674_v62, %v1588_v0 }
 0x141   : > { %v1524_v37 = vpop.f32.mrf.mxu2  ;;  %v4342_v30 = vadd.f32 %v1849_v40, %v1741_v26  ;;  %v1171_v40 = vadd.f32 %v1170_v44, %v4083_v61 }
 0x142   : > { %v1589_v19 = vadd.f32 %v1524_v37, %v1169_v23  ;;  %v4361_v23 = vld [vmem:[%s3618_s10 + $0xc4] sm:$0xf]  ;;  %v1365_v37 = vrot.slane %v3881_v32, 5 }
 0x143   : > { %4897 = vst [vmem:[#allocation36_spill] sm:$0xff] %v4342_v30  ;;  %3204 = vmatmul.msk.bf16.gmra.mxu3 %vm846_vm3, %v4339_v25  ;;  %v1774_v61 = vshll.u32 %v4361_v23, 16  ;;  %v1778_v44 = vshrl.u32 %v4361_v23, 16 }
 0x144   : > { %4899 = vst [vmem:[#allocation38_spill] sm:$0xff] %v4361_v23 }
 0x145   : > { %v1852_v0 = vpop.f32.mrf.mxu0  ;;  %v1776_v6 = vrot.slane %v1774_v61, 5  ;;  %v1780_v23 = vrot.slane %v1778_v44, 4 }
 0x146   : > { %v1677_v9 = vpop.f32.mrf.mxu3  ;;  %v1173_v62 = vpop.f32.mrf.mxu1 }
 0x147   : > { %v1742_v50 = vadd.f32 %v1677_v9, %v1589_v19  ;;  %v382_v19 = vld [vmem:[%s3618_s10 + $0xb4] sm:$0xe]  ;;  %v1768_v9 = vshll.u32 %v345_v53, 16  ;;  %v1767_v53 = vrot.slane %v1765_v48, 4 }
 0x148   : > { %3233 = vmatmul.msk.bf16.gmra.mxu0 %vm846_vm3, %v3860_v49  ;;  %v3144_v32 = vrot.slane %v382_v19, 9  ;;  %v1784_v19 = vshll.u32 %v4377_v45, 16 }
 0x149   : > { %v1526_v26 = vpop.f32.mrf.mxu2  ;;  %3127 = vmatmul.msk.bf16.gmra.mxu1 %vm846_vm3, %v4339_v25  ;;  %v4356_v57 = vadd.f32 %v1852_v0, %v1742_v50  ;;  %v4371_v50 = vld [vmem:[%s3618_s10 + $0xb4] sm:$0xff]  ;;  %v1770_v49 = vrot.slane %v1768_v9, 5 }
 0x14a   : > { %v1590_v12 = vadd.f32 %v1526_v26, %v1171_v40  ;;  %v1367_v40 = vrot.slane %v1365_v37, 4  ;;  %v1174_v26 = vadd.f32 %v1173_v62, %v4103_v17  ;;  %v1366_v38 = vsel %vm3935_vm7, %v3144_v32, %v1365_v37 }
 0x14b   : > { %4898 = vst [vmem:[#allocation37_spill] sm:$0xff] %v4356_v57  ;;  %v1771_v62 = vor.u32 %v1770_v49, %v1767_v53  ;;  %v1406_v9 = vunpack.c.l.b16 %v1366_v38 }
 0x14d   : > { %v1854_v35 = vpop.f32.mrf.mxu0 }
 0x14e   : > { %v1679_v30 = vpop.f32.mrf.mxu3  ;;  %3172 = vmatmul.msk.bf16.gmra.mxu2 %vm846_vm3, %v4358_v2  ;;  %v1175_v0 = vpop.f32.mrf.mxu1 }
 0x14f   : > { %v1743_v34 = vadd.f32 %v1679_v30, %v1590_v12  ;;  %v1369_v30 = vsel %vm3935_vm7, %v1367_v40, %v1368_v36  ;;  %v1781_v12 = vor.u32 %v1780_v23, %v1776_v6  ;;  %v1176_v44 = vadd.f32 %v1175_v0, %v4124_v56 }
 0x150   : > { %v1772_v36 = vrot.slane %v1771_v62, 4  ;;  %v1786_v23 = vrot.slane %v1784_v19, 5 }
 0x151   : > { %v1529_v57 = vpop.f32.mrf.mxu2  ;;  %v4374_v25 = vadd.f32 %v1854_v35, %v1743_v34  ;;  %v1782_v49 = vrot.slane %v1781_v12, 4 }
 0x152   : > { %v1591_v28 = vadd.f32 %v1529_v57, %v1174_v26  ;;  %v1407_v57 = vunpack.c.l.b16 %v1369_v30  ;;  %v4402_v30 = vld [vmem:[%s3618_s10 + $0xc0] sm:$0xff] }
 0x153   : > { %3205 = vmatmul.msk.bf16.gmra.mxu3 %vm846_vm3, %v4371_v50  ;;  %v1787_v56 = vsel %vm3650_vm4, %v1782_v49, %v1786_v23 }
 0x154   : > { %v4393_v40 = vpack.c.b16 %v1407_v57, %v1406_v9  ;;  %v1795_v12 = vunpack.c.l.b16 %v1787_v56 }
 0x155   : > { %v1857_v17 = vpop.f32.mrf.mxu0 }
 0x156   : > { %v1682_v48 = vpop.f32.mrf.mxu3  ;;  %v1178_v35 = vpop.f32.mrf.mxu1 }
 0x157   : > { %v1744_v61 = vadd.f32 %v1682_v48, %v1591_v28  ;;  %v1777_v28 = vsel %vm3650_vm4, %v1772_v36, %v1776_v6 }
 0x158   : > { %3234 = vmatmul.msk.bf16.gmra.mxu0 %vm846_vm3, %v3940_v58  ;;  %v1794_v62 = vunpack.c.l.b16 %v1777_v28 }
 0x159   : > { %v1531_v37 = vpop.f32.mrf.mxu2  ;;  %3128 = vmatmul.msk.bf16.gmra.mxu1 %vm846_vm3, %v4371_v50  ;;  %v4391_v34 = vadd.f32 %v1857_v17, %v1744_v61  ;;  %v1179_v17 = vadd.f32 %v1178_v35, %v4145_v52 }
 0x15a   : > { %v1592_v32 = vadd.f32 %v1531_v37, %v1176_v44  ;;  %v4409_v6 = vpack.c.b16 %v1795_v12, %v1794_v62 }
 0x15d   : > { %v1859_v26 = vpop.f32.mrf.mxu0 }
 0x15e   : > { %v1684_v0 = vpop.f32.mrf.mxu3  ;;  %3173 = vmatmul.msk.bf16.gmra.mxu2 %vm846_vm3, %v4393_v40  ;;  %v1180_v53 = vpop.f32.mrf.mxu1 }
 0x15f   : > { %v1745_v38 = vadd.f32 %v1684_v0, %v1592_v32  ;;  %v1181_v52 = vadd.f32 %v1180_v53, %v4163_v18 }
 0x161   : > { %v1534_v19 = vpop.f32.mrf.mxu2  ;;  %v4405_v48 = vadd.f32 %v1859_v26, %v1745_v38 }
 0x162   : > { %v1593_v9 = vadd.f32 %v1534_v19, %v1179_v17 }
 0x163   : > { %3206 = vmatmul.msk.bf16.gmra.mxu3 %vm846_vm3, %v4402_v30 }
 0x165   : > { %v1862_v57 = vpop.f32.mrf.mxu0 }
 0x166   : > { %v1687_v61 = vpop.f32.mrf.mxu3  ;;  %v1183_v44 = vpop.f32.mrf.mxu1 }
 0x167   : > { %v1746_v37 = vadd.f32 %v1687_v61, %v1593_v9  ;;  %v1184_v56 = vadd.f32 %v1183_v44, %v4035_v3 }
 0x168   : > { %3235 = vmatmul.msk.bf16.gmra.mxu0 %vm846_vm3, %v4409_v6 }
 0x169   : > { %v1536_v35 = vpop.f32.mrf.mxu2  ;;  %3250 = vmatmul.msk.bf16.vlgmr.msra.gmra.mxu1 %vm846_vm3, %v3975_v10  ;;  %v4416_v36 = vadd.f32 %v1862_v57, %v1746_v37 }
 0x16a   : > { %v1594_v49 = vadd.f32 %v1536_v35, %v1181_v52 }
 0x16d   : > { %v1864_v23 = vpop.f32.mrf.mxu0 }
 0x16e   : > { %v1689_v32 = vpop.f32.mrf.mxu3  ;;  %3283 = vmatmul.msk.bf16.vlgmr.msra.gmra.mxu2 %vm846_vm3, %v3982_v8  ;;  %v1185_v26 = vpop.f32.mrf.mxu1 }
 0x16f   : > { %v1747_v28 = vadd.f32 %v1689_v32, %v1594_v49  ;;  %v1186_v8 = vadd.f32 %v1185_v26, %v4066_v21 }
 0x171   : > { %v1539_v0 = vpop.f32.mrf.mxu2  ;;  %v4421_v38 = vadd.f32 %v1864_v23, %v1747_v28 }
 0x172   : > { %v1595_v18 = vadd.f32 %v1539_v0, %v1184_v56 }
 0x173   : > { %3312 = vmatmul.msk.bf16.vlgmr.msra.gmra.mxu3 %vm846_vm3, %v3878_v14 }
 0x175   : > { %v1867_v10 = vpop.f32.mrf.mxu0 }
 0x176   : > { %v1692_v53 = vpop.f32.mrf.mxu3  ;;  %v1188_v17 = vpop.f32.mrf.mxu1 }
 0x177   : > { %v1748_v62 = vadd.f32 %v1692_v53, %v1595_v18  ;;  %v1189_v44 = vadd.f32 %v1188_v17, %v4089_v29 }
 0x178   : > { %3342 = vmatmul.msk.bf16.vlgmr.msra.gmra.mxu0 %vm846_vm3, %v3995_v15 }
 0x179   : > { %v1541_v12 = vpop.f32.mrf.mxu2  ;;  %3251 = vmatmul.msk.bf16.gmra.mxu1 %vm846_vm3, %v3995_v15  ;;  %v4430_v3 = vadd.f32 %v1867_v10, %v1748_v62 }
 0x17a   : > { %v1596_v19 = vadd.f32 %v1541_v12, %v1186_v8  ;;  %v4900_v12 = vld [vmem:[#allocation19_spill] sm:$0xff] }
 0x17d   : > { %v1869_v9 = vpop.f32.mrf.mxu0 }
 0x17e   : > { %v1694_v57 = vpop.f32.mrf.mxu3  ;;  %3284 = vmatmul.msk.bf16.gmra.mxu2 %vm846_vm3, %v4002_v31  ;;  %v1190_v14 = vpop.f32.mrf.mxu1 }
 0x17f   : > { %v1749_v61 = vadd.f32 %v1694_v57, %v1596_v19  ;;  %v1191_v31 = vadd.f32 %v1190_v14, %v4107_v4 }
 0x181   : > { %v1544_v37 = vpop.f32.mrf.mxu2  ;;  %v4435_v52 = vadd.f32 %v1869_v9, %v1749_v61  ;;  %v4901_v61 = vld [vmem:[#allocation10_spill] sm:$0xff] }
 0x182   : > { %v1597_v21 = vadd.f32 %v1544_v37, %v1189_v44  ;;  %v4902_v37 = vld [vmem:[#allocation23_spill] sm:$0xff] }
 0x183   : > { %3313 = vmatmul.msk.bf16.gmra.mxu3 %vm846_vm3, %v3957_v43 }
 0x185   : > { %v1872_v15 = vpop.f32.mrf.mxu0 }
 0x186   : > { %v1697_v35 = vpop.f32.mrf.mxu3  ;;  %v1193_v49 = vpop.f32.mrf.mxu1 }
 0x187   : > { %v1750_v23 = vadd.f32 %v1697_v35, %v1597_v21  ;;  %v1194_v18 = vadd.f32 %v1193_v49, %v4127_v24 }
 0x188   : > { %3343 = vmatmul.msk.bf16.gmra.mxu0 %vm846_vm3, %v4015_v46 }
 0x189   : > { %v1546_v32 = vpop.f32.mrf.mxu2  ;;  %3252 = vmatmul.msk.bf16.gmra.mxu1 %vm846_vm3, %v4015_v46  ;;  %v4444_v29 = vadd.f32 %v1872_v15, %v1750_v23  ;;  %v4903_v23 = vld [vmem:[#allocation4_spill] sm:$0xff] }
 0x18a   : > { %v1598_v26 = vadd.f32 %v1546_v32, %v1191_v31 }
 0x18d   : > { %v1874_v28 = vpop.f32.mrf.mxu0 }
 0x18e   : > { %v1699_v56 = vpop.f32.mrf.mxu3  ;;  %3285 = vmatmul.msk.bf16.gmra.mxu2 %vm846_vm3, %v4024_v60  ;;  %v1195_v43 = vpop.f32.mrf.mxu1 }
 0x18f   : > { %v1751_v0 = vadd.f32 %v1699_v56, %v1598_v26  ;;  %v1196_v60 = vadd.f32 %v1195_v43, %v4900_v12  ;;  %v4905_v56 = vld [vmem:[#allocation25_spill] sm:$0xff] }
 0x190   : > { %v4907_v12 = vld [vmem:[#allocation9_spill] sm:$0xff] }
 0x191   : > { %v1549_v10 = vpop.f32.mrf.mxu2  ;;  %v4449_v53 = vadd.f32 %v1874_v28, %v1751_v0  ;;  %v4904_v28 = vld [vmem:[#allocation12_spill] sm:$0xff] }
 0x192   : > { %v1599_v4 = vadd.f32 %v1549_v10, %v1194_v18 }
 0x193   : > { %3314 = vmatmul.msk.bf16.gmra.mxu3 %vm846_vm3, %v3662_v5 }
 0x195   : > { %v1877_v46 = vpop.f32.mrf.mxu0 }
 0x196   : > { %v1702_v17 = vpop.f32.mrf.mxu3  ;;  %v1198_v62 = vpop.f32.mrf.mxu1 }
 0x197   : > { %v1752_v8 = vadd.f32 %v1702_v17, %v1599_v4  ;;  %v1199_v21 = vadd.f32 %v1198_v62, %v4902_v37  ;;  %v4906_v17 = vld [vmem:[#allocation13_spill] sm:$0xff] }
 0x198   : > { %3344 = vmatmul.msk.bf16.gmra.mxu0 %vm846_vm3, %v4052_v22 }
 0x199   : > { %v1551_v19 = vpop.f32.mrf.mxu2  ;;  %3253 = vmatmul.msk.bf16.gmra.mxu1 %vm846_vm3, %v4052_v22  ;;  %v4458_v24 = vadd.f32 %v1877_v46, %v1752_v8 }
 0x19a   : > { %v1600_v9 = vadd.f32 %v1551_v19, %v1196_v60 }
 0x19d   : > { %v1879_v57 = vpop.f32.mrf.mxu0 }
 0x19e   : > { %v1704_v14 = vpop.f32.mrf.mxu3  ;;  %3286 = vmatmul.msk.bf16.gmra.mxu2 %vm846_vm3, %v4901_v61  ;;  %v1200_v5 = vpop.f32.mrf.mxu1 }
 0x19f   : > { %v1753_v44 = vadd.f32 %v1704_v14, %v1600_v9  ;;  %v1201_v43 = vadd.f32 %v1200_v5, %v4905_v56  ;;  %v4908_v14 = vld [vmem:[#allocation6_spill] sm:$0xff] }
 0x1a1   : > { %v1554_v15 = vpop.f32.mrf.mxu2  ;;  %v4463_v35 = vadd.f32 %v1879_v57, %v1753_v44 }
 0x1a2   : > { %v1601_v49 = vadd.f32 %v1554_v15, %v1199_v21  ;;  %v4909_v21 = vld [vmem:[#allocation16_spill] sm:$0xff]  ;;  %v4910_v15 = vld [vmem:[#allocation11_spill] sm:$0xff] }
 0x1a3   : > { %3315 = vmatmul.msk.bf16.gmra.mxu3 %vm846_vm3, %v4903_v23 }
 0x1a5   : > { %v1882_v22 = vpop.f32.mrf.mxu0 }
 0x1a6   : > { %v1707_v31 = vpop.f32.mrf.mxu3  ;;  %v1203_v32 = vpop.f32.mrf.mxu1 }
 0x1a7   : > { %v1754_v26 = vadd.f32 %v1707_v31, %v1601_v49  ;;  %v1204_v60 = vadd.f32 %v1203_v32, %v4907_v12 }
 0x1a8   : > { %3345 = vmatmul.msk.bf16.gmra.mxu0 %vm846_vm3, %v4904_v28 }
 0x1a9   : > { %v1556_v0 = vpop.f32.mrf.mxu2  ;;  %3254 = vmatmul.msk.bf16.gmra.mxu1 %vm846_vm3, %v4904_v28  ;;  %v4472_v18 = vadd.f32 %v1882_v22, %v1754_v26  ;;  %v4911_v28 = vld [vmem:[#allocation17_spill] sm:$0xff] }
 0x1aa   : > { %v1602_v10 = vadd.f32 %v1556_v0, %v1201_v43  ;;  %v4912_v0 = vld [vmem:[#allocation14_spill] sm:$0xff] }
 0x1ad   : > { %v1884_v4 = vpop.f32.mrf.mxu0 }
 0x1ae   : > { %v1709_v46 = vpop.f32.mrf.mxu3  ;;  %3287 = vmatmul.msk.bf16.gmra.mxu2 %vm846_vm3, %v4906_v17  ;;  %v1205_v62 = vpop.f32.mrf.mxu1 }
 0x1af   : > { %v1755_v8 = vadd.f32 %v1709_v46, %v1602_v10  ;;  %v1206_v49 = vadd.f32 %v1205_v62, %v4910_v15  ;;  %v4913_v62 = vld [vmem:[#allocation8_spill] sm:$0xff] }
 0x1b1   : > { %v1559_v19 = vpop.f32.mrf.mxu2  ;;  %v4477_v9 = vadd.f32 %v1884_v4, %v1755_v8 }
 0x1b2   : > { %v1603_v57 = vadd.f32 %v1559_v19, %v1204_v60 }
 0x1b3   : > { %3316 = vmatmul.msk.bf16.gmra.mxu3 %vm846_vm3, %v4908_v14  ;;  %v4915_v14 = vld [vmem:[#allocation15_spill] sm:$0xff] }
 0x1b5   : > { %v1887_v61 = vpop.f32.mrf.mxu0 }
 0x1b6   : > { %v1712_v5 = vpop.f32.mrf.mxu3  ;;  %v1208_v44 = vpop.f32.mrf.mxu1 }
 0x1b7   : > { %v1756_v37 = vadd.f32 %v1712_v5, %v1603_v57  ;;  %v1209_v10 = vadd.f32 %v1208_v44, %v4912_v0  ;;  %v4914_v57 = vld [vmem:[#allocation20_spill] sm:$0xff]  ;;  %v4918_v0 = vld [vmem:[#allocation2_spill] sm:$0xff] }
 0x1b8   : > { %3346 = vmatmul.msk.bf16.gmra.mxu0 %vm846_vm3, %v4909_v21 }
 0x1b9   : > { %v1561_v23 = vpop.f32.mrf.mxu2  ;;  %3255 = vmatmul.msk.bf16.gmra.mxu1 %vm846_vm3, %v4909_v21  ;;  %v4486_v22 = vadd.f32 %v1887_v61, %v1756_v37 }
 0x1ba   : > { %v1604_v31 = vadd.f32 %v1561_v23, %v1206_v49  ;;  %v4916_v49 = vld [vmem:[#allocation22_spill] sm:$0xff] }
 0x1bd   : > { %v1889_v32 = vpop.f32.mrf.mxu0 }
 0x1be   : > { %v1714_v26 = vpop.f32.mrf.mxu3  ;;  %3288 = vmatmul.msk.bf16.gmra.mxu2 %vm846_vm3, %v4911_v28  ;;  %v1210_v56 = vpop.f32.mrf.mxu1 }
 0x1bf   : > { %v1757_v43 = vadd.f32 %v1714_v26, %v1604_v31  ;;  %v1211_v61 = vadd.f32 %v1210_v56, %v4915_v14 }
 0x1c1   : > { %v1564_v4 = vpop.f32.mrf.mxu2  ;;  %v4491_v46 = vadd.f32 %v1889_v32, %v1757_v43  ;;  %v4917_v32 = vld [vmem:[#allocation18_spill] sm:$0xff] }
 0x1c2   : > { %v1605_v17 = vadd.f32 %v1564_v4, %v1209_v10 }
 0x1c3   : > { %3317 = vmatmul.msk.bf16.gmra.mxu3 %vm846_vm3, %v4913_v62 }
 0x1c5   : > { %v1892_v8 = vpop.f32.mrf.mxu0 }
 0x1c6   : > { %v1717_v12 = vpop.f32.mrf.mxu3  ;;  %v1213_v60 = vpop.f32.mrf.mxu1 }
 0x1c7   : > { %v1758_v19 = vadd.f32 %v1717_v12, %v1605_v17  ;;  %v1214_v26 = vadd.f32 %v1213_v60, %v4917_v32  ;;  %v4920_v12 = vld [vmem:[#allocation21_spill] sm:$0xff] }
 0x1c8   : > { %3347 = vmatmul.msk.bf16.gmra.mxu0 %vm846_vm3, %v4914_v57 }
 0x1c9   : > { %v1566_v5 = vpop.f32.mrf.mxu2  ;;  %3256 = vmatmul.msk.bf16.gmra.mxu1 %vm846_vm3, %v4914_v57  ;;  %v4500_v44 = vadd.f32 %v1892_v8, %v1758_v19  ;;  %v4919_v8 = vld [vmem:[#allocation26_spill] sm:$0xff] }
 0x1ca   : > { %v1606_v37 = vadd.f32 %v1566_v5, %v1211_v61 }
 0x1cd   : > { %v1894_v21 = vpop.f32.mrf.mxu0 }
 0x1ce   : > { %v1719_v15 = vpop.f32.mrf.mxu3  ;;  %3289 = vmatmul.msk.bf16.gmra.mxu2 %vm846_vm3, %v4916_v49  ;;  %v1215_v23 = vpop.f32.mrf.mxu1 }
 0x1cf   : > { %v1759_v31 = vadd.f32 %v1719_v15, %v1606_v37  ;;  %v1216_v19 = vadd.f32 %v1215_v23, %v4920_v12  ;;  %v4921_v15 = vld [vmem:[#allocation24_spill] sm:$0xff] }
 0x1d1   : > { %v1569_v28 = vpop.f32.mrf.mxu2  ;;  %v4505_v43 = vadd.f32 %v1894_v21, %v1759_v31 }
 0x1d2   : > { %v1607_v56 = vadd.f32 %v1569_v28, %v1214_v26 }
 0x1d3   : > { %3318 = vmatmul.msk.bf16.gmra.mxu3 %vm846_vm3, %v4918_v0 }
 0x1d5   : > { %v1897_v10 = vpop.f32.mrf.mxu0 }
 0x1d6   : > { %v1722_v4 = vpop.f32.mrf.mxu3  ;;  %v1218_v17 = vpop.f32.mrf.mxu1 }
 0x1d7   : > { %v1760_v62 = vadd.f32 %v1722_v4, %v1607_v56  ;;  %v1219_v49 = vadd.f32 %v1218_v17, %v4921_v15 }
 0x1d8   : > { %3348 = vmatmul.msk.bf16.gmra.mxu0 %vm846_vm3, %v4919_v8 }
 0x1d9   : > { %v1571_v57 = vpop.f32.mrf.mxu2  ;;  %3257 = vmatmul.msk.bf16.gmra.mxu1 %vm846_vm3, %v4919_v8  ;;  %v4514_v60 = vadd.f32 %v1897_v10, %v1760_v62  ;;  %v4922_v10 = vld [vmem:[#allocation27_spill] sm:$0xff] }
 0x1da   : > { %v1608_v14 = vadd.f32 %v1571_v57, %v1216_v19 }
 0x1dd   : > { %v1899_v61 = vpop.f32.mrf.mxu0 }
 0x1de   : > { %v1724_v5 = vpop.f32.mrf.mxu3  ;;  %3290 = vmatmul.msk.bf16.gmra.mxu2 %vm846_vm3, %v4200_v20  ;;  %v1220_v37 = vpop.f32.mrf.mxu1 }
 0x1df   : > { %v1761_v21 = vadd.f32 %v1724_v5, %v1608_v14  ;;  %v1221_v20 = vadd.f32 %v1220_v37, %v4922_v10  ;;  %v4553_v10 = vld [vmem:[%s4831_s2 + $0x1] ss:$0 sm:$0xff] }
 0x1e1   : > { %v1574_v31 = vpop.f32.mrf.mxu2  ;;  %v4519_v32 = vadd.f32 %v1899_v61, %v1761_v21 }
 0x1e2   : > { %v1609_v23 = vadd.f32 %v1574_v31, %v1219_v49  ;;  %v4540_v49 = vld [vmem:[%s4831_s2] ss:$0 sm:$0xff] }
 0x1e3   : > { %3319 = vmatmul.msk.bf16.gmra.mxu3 %vm846_vm3, %v3770_v16 }
 0x1e5   : > { %v1902_v26 = vpop.f32.mrf.mxu0 }
 0x1e6   : > { %v1727_v28 = vpop.f32.mrf.mxu3  ;;  %v1987_v56 = vpop.f32.mrf.mxu1 }
 0x1e7   : > { %v1762_v0 = vadd.f32 %v1727_v28, %v1609_v23  ;;  %v2067_v57 = vadd.f32 %v1987_v56, %v4214_v27 }
 0x1e8   : > { %3349 = vmatmul.msk.bf16.gmra.mxu0 %vm846_vm3, %v4216_v51 }
 0x1e9   : > { %v1576_v4 = vpop.f32.mrf.mxu2  ;;  %3258 = vmatmul.msk.bf16.gmra.mxu1 %vm846_vm3, %v4216_v51  ;;  %v4528_v17 = vadd.f32 %v1902_v26, %v1762_v0 }
 0x1ea   : > { %v1610_v62 = vadd.f32 %v1576_v4, %v1221_v20  ;;  %v4559_v4 = vld [vmem:[%s4831_s2 + $0x2] ss:$0 sm:$0xff] }
 0x1ed   : > { %v1904_v8 = vpop.f32.mrf.mxu0 }
 0x1ee   : > { %v1729_v12 = vpop.f32.mrf.mxu3  ;;  %3291 = vmatmul.msk.bf16.gmra.mxu2 %vm846_vm3, %v4224_v59  ;;  %v1989_v16 = vpop.f32.mrf.mxu1 }
 0x1ef   : > { %v1763_v19 = vadd.f32 %v1729_v12, %v1610_v62  ;;  %v2068_v59 = vadd.f32 %v1989_v16, %v4233_v63 }
 0x1f1   : > { %v2140_v14 = vpop.f32.mrf.mxu2  ;;  %v4533_v61 = vadd.f32 %v1904_v8, %v1763_v19 }
 0x1f2   : > { %v2220_v5 = vadd.f32 %v2140_v14, %v2067_v57 }
 0x1f3   : > { %3320 = vmatmul.msk.bf16.gmra.mxu3 %vm846_vm3, %v3839_v7 }
 0x1f5   : > { %v2475_v51 = vpop.f32.mrf.mxu0 }
 0x1f6   : > { %v2315_v37 = vpop.f32.mrf.mxu3  ;;  %v1992_v21 = vpop.f32.mrf.mxu1 }
 0x1f7   : > { %v2395_v15 = vadd.f32 %v2315_v37, %v2220_v5  ;;  %v2069_v20 = vadd.f32 %v1992_v21, %v4252_v1 }
 0x1f8   : > { %3350 = vmatmul.msk.bf16.gmra.mxu0 %vm846_vm3, %v4254_v54 }
 0x1f9   : > { %v2555_v27 = vadd.f32 %v2475_v51, %v2395_v15  ;;  %v2142_v31 = vpop.f32.mrf.mxu2  ;;  %3259 = vmatmul.msk.bf16.gmra.mxu1 %vm846_vm3, %v4254_v54  ;;  %v4923_v51 = vld [vmem:[#allocation28_spill] sm:$0xff] }
 0x1fa   : > { %v2221_v23 = vadd.f32 %v2142_v31, %v2068_v59 }
 0x1fb   : > { %v2591_v7 = vadd.f32 %v4540_v49, %v2555_v27 }
 0x1fd   : > { %3436 = vtanh.f32 %v2591_v7  ;;  %v2477_v26 = vpop.f32.mrf.mxu0 }
 0x1fe   : > { %v2317_v28 = vpop.f32.mrf.mxu3  ;;  %3292 = vmatmul.msk.bf16.gmra.mxu2 %vm846_vm3, %v4262_v13  ;;  %v1994_v56 = vpop.f32.mrf.mxu1 }
 0x1ff   : > { %v2396_v0 = vadd.f32 %v2317_v28, %v2221_v23  ;;  %v2070_v37 = vadd.f32 %v1994_v56, %v4923_v51  ;;  %v4927_v51 = vld [vmem:[#allocation31_spill] sm:$0xff] }
 0x201   : > { %v2556_v63 = vadd.f32 %v2477_v26, %v2396_v0  ;;  %v2145_v54 = vpop.f32.mrf.mxu2  ;;  %v4924_v26 = vld [vmem:[#allocation30_spill] sm:$0xff] }
 0x202   : > { %v2222_v13 = vadd.f32 %v2145_v54, %v2069_v20 }
 0x203   : > { %v3437_v62 = vpop.eup %3436  ;;  %v2592_v8 = vadd.f32 %v4540_v49, %v2556_v63  ;;  %3321 = vmatmul.msk.bf16.gmra.mxu3 %vm846_vm3, %v3915_v55  ;;  %v4925_v63 = vld [vmem:[#allocation29_spill] sm:$0xff] }
 0x204   : > { %v2656_v12 = vmul.f32 %v3437_v62, %v4553_v10 }
 0x205   : > { %3438 = vtanh.f32 %v2592_v8  ;;  %v2480_v16 = vpop.f32.mrf.mxu0  ;;  %v4926_v8 = vld [vmem:[#allocation3_spill] sm:$0xff] }
 0x206   : > { %v2320_v19 = vpop.f32.mrf.mxu3  ;;  %v2689_v1 = vadd.f32 %v4559_v4, %v2656_v12  ;;  %v1997_v57 = vpop.f32.mrf.mxu1 }
 0x207   : > { %v2397_v14 = vadd.f32 %v2320_v19, %v2222_v13 }
 0x208   : > { %3351 = vmatmul.msk.bf16.gmra.mxu0 %vm846_vm3, %v4280_v39  ;;  %2721 = vxpose.xlu0.b32.start [1/16] %v2689_v1, 128 }
 0x209   : > { %v2557_v5 = vadd.f32 %v2480_v16, %v2397_v14  ;;  %v2147_v21 = vpop.f32.mrf.mxu2  ;;  %3260 = vmatmul.msk.bf16.gmra.mxu1 %vm846_vm3, %v4280_v39  ;;  %v2071_v39 = vadd.f32 %v1997_v57, %v4925_v63 }
 0x20a   : > { %v2223_v27 = vadd.f32 %v2147_v21, %v2070_v37 }
 0x20b   : > { %v3439_v55 = vpop.eup %3438  ;;  %v2593_v15 = vadd.f32 %v4540_v49, %v2557_v5 }
 0x20c   : > { %v2657_v59 = vmul.f32 %v3439_v55, %v4553_v10 }
 0x20d   : > { %3440 = vtanh.f32 %v2593_v15  ;;  %v2482_v31 = vpop.f32.mrf.mxu0 }
 0x20e   : > { %v2322_v7 = vpop.f32.mrf.mxu3  ;;  %v2690_v23 = vadd.f32 %v4559_v4, %v2657_v59  ;;  %3293 = vmatmul.msk.bf16.gmra.mxu2 %vm846_vm3, %v4924_v26  ;;  %v1999_v28 = vpop.f32.mrf.mxu1 }
 0x20f   : > { %v2398_v56 = vadd.f32 %v2322_v7, %v2223_v27  ;;  %v2072_v37 = vadd.f32 %v1999_v28, %v4927_v51 }
 0x210   : > { %2722 = vxpose.xlu0.b32.cont [2/16] %v2690_v23, 128 }
 0x211   : > { %v2558_v0 = vadd.f32 %v2482_v31, %v2398_v56  ;;  %v2150_v20 = vpop.f32.mrf.mxu2 }
 0x212   : > { %v2224_v13 = vadd.f32 %v2150_v20, %v2071_v39  ;;  %v4928_v20 = vld [vmem:[#allocation5_spill] sm:$0xff] }
 0x213   : > { %v3441_v54 = vpop.eup %3440  ;;  %v2594_v62 = vadd.f32 %v4540_v49, %v2558_v0  ;;  %3322 = vmatmul.msk.bf16.gmra.mxu3 %vm846_vm3, %v4926_v8 }
 0x214   : > { %v2658_v12 = vmul.f32 %v3441_v54, %v4553_v10 }
 0x215   : > { %3442 = vtanh.f32 %v2594_v62  ;;  %v2485_v16 = vpop.f32.mrf.mxu0 }
 0x216   : > { %v2325_v19 = vpop.f32.mrf.mxu3  ;;  %v2691_v1 = vadd.f32 %v4559_v4, %v2658_v12  ;;  %v2002_v14 = vpop.f32.mrf.mxu1 }
 0x217   : > { %v2399_v5 = vadd.f32 %v2325_v19, %v2224_v13  ;;  %v4929_v19 = vld [vmem:[#allocation34_spill] sm:$0xff] }
 0x218   : > { %3352 = vmatmul.msk.bf16.gmra.mxu0 %vm846_vm3, %v4305_v33  ;;  %2723 = vxpose.xlu0.b32.cont [3/16] %v2691_v1, 128  ;;  %v4930_v1 = vld [vmem:[#allocation32_spill] sm:$0xff] }
 0x219   : > { %v2559_v57 = vadd.f32 %v2485_v16, %v2399_v5  ;;  %v2152_v21 = vpop.f32.mrf.mxu2  ;;  %3261 = vmatmul.msk.bf16.gmra.mxu1 %vm846_vm3, %v4305_v33  ;;  %v2073_v33 = vadd.f32 %v2002_v14, %v4303_v47 }
 0x21a   : > { %v2225_v27 = vadd.f32 %v2152_v21, %v2072_v37 }
 0x21b   : > { %v3443_v55 = vpop.eup %3442  ;;  %v2595_v15 = vadd.f32 %v4540_v49, %v2559_v57 }
 0x21c   : > { %v2659_v59 = vmul.f32 %v3443_v55, %v4553_v10 }
 0x21d   : > { %3444 = vtanh.f32 %v2595_v15  ;;  %v2487_v31 = vpop.f32.mrf.mxu0 }
 0x21e   : > { %v2327_v7 = vpop.f32.mrf.mxu3  ;;  %v2692_v23 = vadd.f32 %v4559_v4, %v2659_v59  ;;  %3294 = vmatmul.msk.bf16.gmra.mxu2 %vm846_vm3, %v4313_v11  ;;  %v2004_v26 = vpop.f32.mrf.mxu1  ;;  %v4931_v59 = vld [vmem:[#allocation35_spill] sm:$0xff] }
 0x21f   : > { %v2400_v28 = vadd.f32 %v2327_v7, %v2225_v27  ;;  %v2074_v14 = vadd.f32 %v2004_v26, %v4930_v1  ;;  %v4932_v26 = vld [vmem:[#allocation33_spill] sm:$0xff] }
 0x220   : > { %2724 = vxpose.xlu0.b32.cont [4/16] %v2692_v23, 128 }
 0x221   : > { %v2560_v56 = vadd.f32 %v2487_v31, %v2400_v28  ;;  %v2155_v0 = vpop.f32.mrf.mxu2 }
 0x222   : > { %v2226_v54 = vadd.f32 %v2155_v0, %v2073_v33 }
 0x223   : > { %v3445_v63 = vpop.eup %3444  ;;  %v2596_v39 = vadd.f32 %v4540_v49, %v2560_v56  ;;  %3323 = vmatmul.msk.bf16.gmra.mxu3 %vm846_vm3, %v4928_v20 }
 0x224   : > { %v2660_v62 = vmul.f32 %v3445_v63, %v4553_v10  ;;  %v4933_v63 = vld [vmem:[#allocation7_spill] sm:$0xff] }
 0x225   : > { %3446 = vtanh.f32 %v2596_v39  ;;  %v2490_v8 = vpop.f32.mrf.mxu0 }
 0x226   : > { %v2330_v13 = vpop.f32.mrf.mxu3  ;;  %v2693_v11 = vadd.f32 %v4559_v4, %v2660_v62  ;;  %v2007_v12 = vpop.f32.mrf.mxu1 }
 0x227   : > { %v2401_v16 = vadd.f32 %v2330_v13, %v2226_v54  ;;  %v2075_v28 = vadd.f32 %v2007_v12, %v4932_v26 }
 0x228   : > { %3353 = vmatmul.msk.bf16.gmra.mxu0 %vm846_vm3, %v4929_v19  ;;  %2725 = vxpose.xlu0.b32.cont [5/16] %v2693_v11, 128 }
 0x229   : > { %v2561_v47 = vadd.f32 %v2490_v8, %v2401_v16  ;;  %v2157_v5 = vpop.f32.mrf.mxu2  ;;  %3262 = vmatmul.msk.bf16.gmra.mxu1 %vm846_vm3, %v4929_v19  ;;  %v4934_v16 = vld [vmem:[#allocation36_spill] sm:$0xff] }
 0x22a   : > { %v2227_v37 = vadd.f32 %v2157_v5, %v2074_v14 }
 0x22b   : > { %v3447_v57 = vpop.eup %3446  ;;  %v2597_v51 = vadd.f32 %v4540_v49, %v2561_v47 }
 0x22c   : > { %v2661_v21 = vmul.f32 %v3447_v57, %v4553_v10 }
 0x22d   : > { %3448 = vtanh.f32 %v2597_v51  ;;  %v2492_v55 = vpop.f32.mrf.mxu0 }
 0x22e   : > { %v2332_v15 = vpop.f32.mrf.mxu3  ;;  %v2694_v27 = vadd.f32 %v4559_v4, %v2661_v21  ;;  %3295 = vmatmul.msk.bf16.gmra.mxu2 %vm846_vm3, %v4931_v59  ;;  %v2009_v31 = vpop.f32.mrf.mxu1 }
 0x22f   : > { %v2402_v7 = vadd.f32 %v2332_v15, %v2227_v37  ;;  %v2076_v19 = vadd.f32 %v2009_v31, %v4934_v16 }
 0x230   : > { %2726 = vxpose.xlu0.b32.cont [6/16] %v2694_v27, 128  ;;  %v4935_v27 = vld [vmem:[#allocation37_spill] sm:$0xff] }
 0x231   : > { %v2562_v23 = vadd.f32 %v2492_v55, %v2402_v7  ;;  %v2160_v56 = vpop.f32.mrf.mxu2 }
 0x232   : > { %v2228_v39 = vadd.f32 %v2160_v56, %v2075_v28  ;;  %v383_v28 = vld [vmem:[%s3618_s10 + $0xc0] sm:$0xe] }
 0x233   : > { %v3449_v33 = vpop.eup %3448  ;;  %v2598_v0 = vadd.f32 %v4540_v49, %v2562_v23  ;;  %3324 = vmatmul.msk.bf16.gmra.mxu3 %vm846_vm3, %v4933_v63  ;;  %v4936_v56 = vld [vmem:[#allocation38_spill] sm:$0xff] }
 0x234   : > { %v2662_v20 = vmul.f32 %v3449_v33, %v4553_v10  ;;  %v1943_v33 = vrot.slane %v4936_v56, 5 }
 0x235   : > { %3450 = vtanh.f32 %v2598_v0  ;;  %v2495_v54 = vpop.f32.mrf.mxu0  ;;  %v347_v0 = vld [vmem:[%s3618_s10 + $0xcc] sm:$0xf] }
 0x236   : > { %v2335_v62 = vpop.f32.mrf.mxu3  ;;  %v2695_v8 = vadd.f32 %v4559_v4, %v2662_v20  ;;  %v2012_v13 = vpop.f32.mrf.mxu1  ;;  %v2256_v16 = vshll.u32 %v347_v0, 16 }
 0x237   : > { %v2403_v11 = vadd.f32 %v2335_v62, %v2228_v39  ;;  %v2077_v59 = vadd.f32 %v2012_v13, %v4935_v27  ;;  %v4633_v39 = vld [vmem:[%s3618_s10 + $0xd0] sm:$0xf] }
 0x238   : > { %3354 = vmatmul.msk.bf16.gmra.mxu0 %vm846_vm3, %v4358_v2  ;;  %2727 = vxpose.xlu0.b32.cont [7/16] %v2695_v8, 128  ;;  %v3236_v8 = vrot.slane %v383_v28, 9  ;;  %v2258_v27 = vrot.slane %v2256_v16, 5 }
 0x239   : > { %v2563_v12 = vadd.f32 %v2495_v54, %v2403_v11  ;;  %v2162_v47 = vpop.f32.mrf.mxu2  ;;  %3263 = vmatmul.msk.bf16.gmra.mxu1 %vm846_vm3, %v4358_v2  ;;  %v1945_v11 = vrot.slane %v1943_v33, 4 }
 0x23a   : > { %v2229_v5 = vadd.f32 %v2162_v47, %v2076_v19  ;;  %v2262_v19 = vshll.u32 %v4633_v39, 16  ;;  %v2266_v47 = vshrl.u32 %v4633_v39, 16 }
 0x23b   : > { %v3451_v1 = vpop.eup %3450  ;;  %v2599_v14 = vadd.f32 %v4540_v49, %v2563_v12  ;;  %v2253_v12 = vshrl.u32 %v347_v0, 16 }
 0x23c   : > { %v2663_v57 = vmul.f32 %v3451_v1, %v4553_v10 }
 0x23d   : > { %3452 = vtanh.f32 %v2599_v14  ;;  %v2497_v51 = vpop.f32.mrf.mxu0 }
 0x23e   : > { %v2337_v37 = vpop.f32.mrf.mxu3  ;;  %v2696_v21 = vadd.f32 %v4559_v4, %v2663_v57  ;;  %3296 = vmatmul.msk.bf16.gmra.mxu2 %vm846_vm3, %v4371_v50  ;;  %v2014_v55 = vpop.f32.mrf.mxu1 }
 0x23f   : > { %v2404_v15 = vadd.f32 %v2337_v37, %v2229_v5  ;;  %v2078_v14 = vadd.f32 %v2014_v55, %v4374_v25  ;;  %v2268_v25 = vrot.slane %v2266_v47, 4 }
 0x240   : > { %2728 = vxpose.xlu0.b32.cont [8/16] %v2696_v21, 128 }
 0x241   : > { %v2564_v2 = vadd.f32 %v2497_v51, %v2404_v15  ;;  %v2165_v31 = vpop.f32.mrf.mxu2  ;;  %v2255_v15 = vrot.slane %v2253_v12, 4 }
 0x242   : > { %v2230_v26 = vadd.f32 %v2165_v31, %v2077_v59  ;;  %v2264_v59 = vrot.slane %v2262_v19, 5  ;;  %v366_v31 = vld [vmem:[%s3618_s10 + $0xd4] sm:$0x1] }
 0x243   : > { %v3453_v7 = vpop.eup %3452  ;;  %v2600_v23 = vadd.f32 %v4540_v49, %v2564_v2  ;;  %3325 = vmatmul.msk.bf16.gmra.mxu3 %vm846_vm3, %v3940_v58  ;;  %v1946_v58 = vrot.slane %v4377_v45, 5  ;;  %v1944_v45 = vsel %vm3935_vm7, %v3236_v8, %v1943_v33  ;;  %v2259_v33 = vor.u32 %v2258_v27, %v2255_v15  ;;  %v3380_v27 = vld [vmem:[%s3618_s10 + $0xcc] sm:$0xff] }
 0x244   : > { %v2664_v50 = vmul.f32 %v3453_v7, %v4553_v10  ;;  %v1954_v28 = vunpack.c.l.b16 %v1944_v45  ;;  %v2272_v0 = vshll.u32 %v366_v31, 16 }
 0x245   : > { %3454 = vtanh.f32 %v2600_v23  ;;  %v2500_v63 = vpop.f32.mrf.mxu0  ;;  %v1947_v21 = vsel %vm3935_vm7, %v1945_v11, %v1946_v58  ;;  %v2260_v12 = vrot.slane %v2259_v33, 4 }
 0x246   : > { %v2340_v20 = vpop.f32.mrf.mxu3  ;;  %v2697_v54 = vadd.f32 %v4559_v4, %v2664_v50  ;;  %v2017_v62 = vpop.f32.mrf.mxu1  ;;  %v1955_v56 = vunpack.c.l.b16 %v1947_v21  ;;  %v2269_v50 = vor.u32 %v2268_v25, %v2264_v59  ;;  %v2274_v19 = vrot.slane %v2272_v0, 5 }
 0x247   : > { %v2405_v13 = vadd.f32 %v2340_v20, %v2230_v26  ;;  %v2079_v20 = vadd.f32 %v2017_v62, %v4391_v34 }
 0x248   : > { %3355 = vmatmul.msk.bf16.gmra.mxu0 %vm846_vm3, %v4393_v40  ;;  %2729 = vxpose.xlu0.b32.cont [9/16] %v2697_v54, 128  ;;  %v2270_v16 = vrot.slane %v2269_v50, 4 }
 0x249   : > { %v2565_v1 = vadd.f32 %v2500_v63, %v2405_v13  ;;  %v2167_v5 = vpop.f32.mrf.mxu2  ;;  %3264 = vmatmul.msk.bf16.gmra.mxu1 %vm846_vm3, %v4393_v40 }
 0x24a   : > { %v2231_v37 = vadd.f32 %v2167_v5, %v2078_v14  ;;  %v2431_v14 = vrot.slane %v4633_v39, 5 }
 0x24b   : > { %v3455_v57 = vpop.eup %3454  ;;  %v2601_v51 = vadd.f32 %v4540_v49, %v2565_v1  ;;  %v384_v1 = vld [vmem:[%s3618_s10 + $0xcc] sm:$0xe] }
 0x24c   : > { %v2665_v2 = vmul.f32 %v3455_v57, %v4553_v10  ;;  %v2275_v57 = vsel %vm3650_vm4, %v2270_v16, %v2274_v19  ;;  %v2433_v15 = vrot.slane %v2431_v14, 4 }
 0x24d   : > { %3456 = vtanh.f32 %v2601_v51  ;;  %v2502_v55 = vpop.f32.mrf.mxu0  ;;  %v3328_v51 = vrot.slane %v384_v1, 9 }
 0x24e   : > { %v2342_v40 = vpop.f32.mrf.mxu3  ;;  %v2698_v7 = vadd.f32 %v4559_v4, %v2665_v2  ;;  %3297 = vmatmul.msk.bf16.gmra.mxu2 %vm846_vm3, %v4402_v30  ;;  %v2019_v23 = vpop.f32.mrf.mxu1  ;;  %v1956_v30 = vpack.c.b16 %v1955_v56, %v1954_v28  ;;  %v2434_v2 = vrot.slane %v366_v31, 5 }
 0x24f   : > { %v2406_v26 = vadd.f32 %v2342_v40, %v2231_v37  ;;  %v2080_v21 = vadd.f32 %v2019_v23, %v4405_v48  ;;  %v2432_v28 = vsel %vm3935_vm7, %v3328_v51, %v2431_v14 }
 0x250   : > { %2730 = vxpose.xlu0.b32.cont [10/16] %v2698_v7, 128  ;;  %v2435_v48 = vsel %vm3935_vm7, %v2433_v15, %v2434_v2  ;;  %v2442_v0 = vunpack.c.l.b16 %v2432_v28 }
 0x251   : > { %v2566_v63 = vadd.f32 %v2502_v55, %v2406_v26  ;;  %v2170_v54 = vpop.f32.mrf.mxu2  ;;  %v2283_v26 = vunpack.c.l.b16 %v2275_v57 }
 0x252   : > { %v2232_v11 = vadd.f32 %v2170_v54, %v2079_v20 }
 0x253   : > { %v3457_v8 = vpop.eup %3456  ;;  %v2602_v13 = vadd.f32 %v4540_v49, %v2566_v63  ;;  %3326 = vmatmul.msk.bf16.gmra.mxu3 %vm846_vm3, %v4409_v6  ;;  %v2265_v6 = vsel %vm3650_vm4, %v2260_v12, %v2264_v59  ;;  %v2443_v63 = vunpack.c.l.b16 %v2435_v48 }
 0x254   : > { %v2666_v58 = vmul.f32 %v3457_v8, %v4553_v10  ;;  %v2282_v7 = vunpack.c.l.b16 %v2265_v6 }
 0x255   : > { %3458 = vtanh.f32 %v2602_v13  ;;  %v2505_v47 = vpop.f32.mrf.mxu0 }
 0x256   : > { %v2345_v34 = vpop.f32.mrf.mxu3  ;;  %v2699_v62 = vadd.f32 %v4559_v4, %v2666_v58  ;;  %v2022_v5 = vpop.f32.mrf.mxu1  ;;  %v2284_v50 = vpack.c.b16 %v2283_v26, %v2282_v7 }
 0x257   : > { %v2407_v45 = vadd.f32 %v2345_v34, %v2232_v11  ;;  %v2081_v54 = vadd.f32 %v2022_v5, %v4416_v36  ;;  %v2444_v11 = vpack.c.b16 %v2443_v63, %v2442_v0 }
 0x258   : > { %3356 = vmatmul.msk.bf16.gmra.mxu0 %vm846_vm3, %v1956_v30  ;;  %2731 = vxpose.xlu0.b32.cont [11/16] %v2699_v62, 128 }
 0x259   : > { %v2567_v37 = vadd.f32 %v2505_v47, %v2407_v45  ;;  %v2172_v39 = vpop.f32.mrf.mxu2  ;;  %3265 = vmatmul.msk.bf16.gmra.mxu1 %vm846_vm3, %v1956_v30 }
 0x25a   : > { %v2233_v40 = vadd.f32 %v2172_v39, %v2080_v21 }
 0x25b   : > { %v3459_v25 = vpop.eup %3458  ;;  %v2603_v55 = vadd.f32 %v4540_v49, %v2567_v37 }
 0x25c   : > { %v2667_v59 = vmul.f32 %v3459_v25, %v4553_v10 }
 0x25d   : > { %3460 = vtanh.f32 %v2603_v55  ;;  %v2507_v42 = vpop.f32.mrf.mxu0 }
 0x25e   : > { %v2347_v23 = vpop.f32.mrf.mxu3  ;;  %v2700_v31 = vadd.f32 %v4559_v4, %v2667_v59  ;;  %3298 = vmatmul.msk.bf16.gmra.mxu2 %vm846_vm3, %v3380_v27  ;;  %v2024_v56 = vpop.f32.mrf.mxu1 }
 0x25f   : > { %v2408_v33 = vadd.f32 %v2347_v23, %v2233_v40  ;;  %v2082_v14 = vadd.f32 %v2024_v56, %v4421_v38 }
 0x260   : > { %2732 = vxpose.xlu0.b32.cont [12/16] %v2700_v31, 128 }
 0x261   : > { %v2568_v20 = vadd.f32 %v2507_v42, %v2408_v33  ;;  %v2175_v8 = vpop.f32.mrf.mxu2 }
 0x262   : > { %v2234_v41 = vadd.f32 %v2175_v8, %v2081_v54 }
 0x263   : > { %v3461_v13 = vpop.eup %3460  ;;  %v2604_v30 = vadd.f32 %v4540_v49, %v2568_v20  ;;  %3327 = vmatmul.msk.bf16.gmra.mxu3 %vm846_vm3, %v2284_v50 }
 0x264   : > { %v2668_v58 = vmul.f32 %v3461_v13, %v4553_v10 }
 0x265   : > { %3462 = vtanh.f32 %v2604_v30  ;;  %v2510_v12 = vpop.f32.mrf.mxu0 }
 0x266   : > { %v2350_v16 = vpop.f32.mrf.mxu3  ;;  %v2701_v19 = vadd.f32 %v4559_v4, %v2668_v58  ;;  %v2027_v47 = vpop.f32.mrf.mxu1 }
 0x267   : > { %v2409_v1 = vadd.f32 %v2350_v16, %v2234_v41  ;;  %v2083_v2 = vadd.f32 %v2027_v47, %v4430_v3 }
 0x268   : > { %3357 = vmatmul.msk.bf16.gmra.mxu0 %vm846_vm3, %v2444_v11  ;;  %2733 = vxpose.xlu0.b32.cont [13/16] %v2701_v19, 128 }
 0x269   : > { %v2569_v36 = vadd.f32 %v2510_v12, %v2409_v1  ;;  %v2177_v34 = vpop.f32.mrf.mxu2 }
 0x26a   : > { %v2235_v45 = vadd.f32 %v2177_v34, %v2082_v14 }
 0x26b   : > { %v3463_v62 = vpop.eup %3462  ;;  %v2605_v5 = vadd.f32 %v4540_v49, %v2569_v36 }
 0x26c   : > { %v2669_v6 = vmul.f32 %v3463_v62, %v4553_v10 }
 0x26d   : > { %3464 = vtanh.f32 %v2605_v5  ;;  %v2512_v57 = vpop.f32.mrf.mxu0 }
 0x26e   : > { %v2352_v51 = vpop.f32.mrf.mxu3  ;;  %v2702_v37 = vadd.f32 %v4559_v4, %v2669_v6  ;;  %v2029_v21 = vpop.f32.mrf.mxu1 }
 0x26f   : > { %v2410_v39 = vadd.f32 %v2352_v51, %v2235_v45  ;;  %v2084_v23 = vadd.f32 %v2029_v21, %v4435_v52 }
 0x270   : > { %2734 = vxpose.xlu0.b32.cont [14/16] %v2702_v37, 128 }
 0x271   : > { %v2570_v15 = vadd.f32 %v2512_v57, %v2410_v39  ;;  %v2180_v27 = vpop.f32.mrf.mxu2 }
 0x272   : > { %v2236_v55 = vadd.f32 %v2180_v27, %v2083_v2 }
 0x273   : > { %v3465_v38 = vpop.eup %3464  ;;  %v2606_v25 = vadd.f32 %v4540_v49, %v2570_v15 }
 0x274   : > { %v2670_v40 = vmul.f32 %v3465_v38, %v4553_v10 }
 0x275   : > { %3466 = vtanh.f32 %v2606_v25  ;;  %v2515_v7 = vpop.f32.mrf.mxu0 }
 0x276   : > { %v2355_v26 = vpop.f32.mrf.mxu3  ;;  %v2703_v59 = vadd.f32 %v4559_v4, %v2670_v40  ;;  %v2032_v42 = vpop.f32.mrf.mxu1 }
 0x277   : > { %v2411_v28 = vadd.f32 %v2355_v26, %v2236_v55  ;;  %v2085_v30 = vadd.f32 %v2032_v42, %v4444_v29 }
 0x278   : > { %2735 = vxpose.xlu0.b32.cont [15/16] %v2703_v59, 128 }
 0x279   : > { %v2571_v48 = vadd.f32 %v2515_v7, %v2411_v28  ;;  %v2182_v31 = vpop.f32.mrf.mxu2 }
 0x27a   : > { %v2237_v33 = vadd.f32 %v2182_v31, %v2084_v23 }
 0x27b   : > { %v3467_v3 = vpop.eup %3466  ;;  %v2607_v56 = vadd.f32 %v4540_v49, %v2571_v48 }
 0x27c   : > { %v2671_v50 = vmul.f32 %v3467_v3, %v4553_v10 }
 0x27d   : > { %3468 = vtanh.f32 %v2607_v56  ;;  %v2517_v0 = vpop.f32.mrf.mxu0 }
 0x27e   : > { %v2357_v63 = vpop.f32.mrf.mxu3  ;;  %v2704_v20 = vadd.f32 %v4559_v4, %v2671_v50  ;;  %v2034_v54 = vpop.f32.mrf.mxu1 }
 0x27f   : > { %v2412_v8 = vadd.f32 %v2357_v63, %v2237_v33  ;;  %v2086_v34 = vadd.f32 %v2034_v54, %v4449_v53 }
 0x280   : > { %2736 = vxpose.xlu0.b32.end [16/16] %v2704_v20, 128 }
 0x281   : > { %v2572_v13 = vadd.f32 %v2517_v0, %v2412_v8  ;;  %v2185_v41 = vpop.f32.mrf.mxu2 }
 0x282   : > { %v2238_v58 = vadd.f32 %v2185_v41, %v2085_v30 }
 0x283   : > { %v3469_v52 = vpop.eup %3468  ;;  %v2608_v11 = vadd.f32 %v4540_v49, %v2572_v13 }
 0x284   : > { %v2672_v12 = vmul.f32 %v3469_v52, %v4553_v10 }
 0x285   : > { %3470 = vtanh.f32 %v2608_v11  ;;  %v2520_v16 = vpop.f32.mrf.mxu0 }
 0x286   : > { %v2360_v19 = vpop.f32.mrf.mxu3  ;;  %v2705_v47 = vadd.f32 %v4559_v4, %v2672_v12  ;;  %v2037_v1 = vpop.f32.mrf.mxu1 }
 0x287   : > { %v2413_v36 = vadd.f32 %v2360_v19, %v2238_v58  ;;  %v2087_v2 = vadd.f32 %v2037_v1, %v4458_v24 }
 0x288   : > { %2753 = vxpose.xlu1.b32.start [1/16] %v2705_v47, 128 }
 0x289   : > { %v2573_v14 = vadd.f32 %v2520_v16, %v2413_v36  ;;  %v2187_v62 = vpop.f32.mrf.mxu2 }
 0x28a   : > { %v2239_v45 = vadd.f32 %v2187_v62, %v2086_v34 }
 0x28b   : > { %v3471_v29 = vpop.eup %3470  ;;  %v2609_v5 = vadd.f32 %v4540_v49, %v2573_v14 }
 0x28c   : > { %v2673_v6 = vmul.f32 %v3471_v29, %v4553_v10 }
 0x28d   : > { %3472 = vtanh.f32 %v2609_v5  ;;  %v2522_v57 = vpop.f32.mrf.mxu0 }
 0x28e   : > { %v2362_v51 = vpop.f32.mrf.mxu3  ;;  %v2706_v37 = vadd.f32 %v4559_v4, %v2673_v6  ;;  %v2039_v21 = vpop.f32.mrf.mxu1 }
 0x28f   : > { %v2414_v39 = vadd.f32 %v2362_v51, %v2239_v45  ;;  %v2088_v48 = vadd.f32 %v2039_v21, %v4463_v35 }
 0x290   : > { %2754 = vxpose.xlu1.b32.cont [2/16] %v2706_v37, 128 }
 0x291   : > { %v2574_v15 = vadd.f32 %v2522_v57, %v2414_v39  ;;  %v2190_v27 = vpop.f32.mrf.mxu2 }
 0x292   : > { %v2240_v25 = vadd.f32 %v2190_v27, %v2087_v2 }
 0x293   : > { %v3473_v53 = vpop.eup %3472  ;;  %v2610_v38 = vadd.f32 %v4540_v49, %v2574_v15 }
 0x294   : > { %v2674_v55 = vmul.f32 %v3473_v53, %v4553_v10 }
 0x295   : > { %3474 = vtanh.f32 %v2610_v38  ;;  %v2525_v40 = vpop.f32.mrf.mxu0 }
 0x296   : > { %v2365_v7 = vpop.f32.mrf.mxu3  ;;  %v2707_v26 = vadd.f32 %v4559_v4, %v2674_v55  ;;  %v2042_v59 = vpop.f32.mrf.mxu1 }
 0x297   : > { %v2415_v42 = vadd.f32 %v2365_v7, %v2240_v25  ;;  %v2089_v8 = vadd.f32 %v2042_v59, %v4472_v18 }
 0x298   : > { %2755 = vxpose.xlu1.b32.cont [3/16] %v2707_v26, 128 }
 0x299   : > { %v2575_v28 = vadd.f32 %v2525_v40, %v2415_v42  ;;  %v2192_v23 = vpop.f32.mrf.mxu2 }
 0x29a   : > { %v2241_v3 = vadd.f32 %v2192_v23, %v2088_v48 }
 0x29b   : > { %v3475_v24 = vpop.eup %3474  ;;  %v2611_v31 = vadd.f32 %v4540_v49, %v2575_v28 }
 0x29c   : > { %v2675_v56 = vmul.f32 %v3475_v24, %v4553_v10 }
 0x29d   : > { %3476 = vtanh.f32 %v2611_v31  ;;  %v2527_v33 = vpop.f32.mrf.mxu0 }
 0x29e   : > { %v2367_v50 = vpop.f32.mrf.mxu3  ;;  %v2708_v0 = vadd.f32 %v4559_v4, %v2675_v56  ;;  %v2044_v63 = vpop.f32.mrf.mxu1 }
 0x29f   : > { %v2416_v20 = vadd.f32 %v2367_v50, %v2241_v3  ;;  %v2090_v1 = vadd.f32 %v2044_v63, %v4477_v9 }
 0x2a0   : > { %2756 = vxpose.xlu1.b32.cont [4/16] %v2708_v0, 128 }
 0x2a1   : > { %v2576_v54 = vadd.f32 %v2527_v33, %v2416_v20  ;;  %v2195_v13 = vpop.f32.mrf.mxu2 }
 0x2a2   : > { %v2242_v41 = vadd.f32 %v2195_v13, %v2089_v8 }
 0x2a3   : > { %v3477_v35 = vpop.eup %3476  ;;  %v2612_v30 = vadd.f32 %v4540_v49, %v2576_v54 }
 0x2a4   : > { %v2676_v52 = vmul.f32 %v3477_v35, %v4553_v10 }
 0x2a5   : > { %3478 = vtanh.f32 %v2612_v30  ;;  %v2530_v11 = vpop.f32.mrf.mxu0 }
 0x2a6   : > { %v2370_v58 = vpop.f32.mrf.mxu3  ;;  %v2709_v12 = vadd.f32 %v4559_v4, %v2676_v52  ;;  %v2047_v16 = vpop.f32.mrf.mxu1 }
 0x2a7   : > { %v2417_v19 = vadd.f32 %v2370_v58, %v2242_v41  ;;  %v2091_v37 = vadd.f32 %v2047_v16, %v4486_v22 }
 0x2a8   : > { %2757 = vxpose.xlu1.b32.cont [5/16] %v2709_v12, 128 }
 0x2a9   : > { %v2577_v47 = vadd.f32 %v2530_v11, %v2417_v19  ;;  %v2197_v36 = vpop.f32.mrf.mxu2 }
 0x2aa   : > { %v2243_v34 = vadd.f32 %v2197_v36, %v2090_v1 }
 0x2ab   : > { %v3479_v18 = vpop.eup %3478  ;;  %v2613_v14 = vadd.f32 %v4540_v49, %v2577_v47 }
 0x2ac   : > { %v2677_v62 = vmul.f32 %v3479_v18, %v4553_v10  ;;  %v4721_v9 = vpop.trf.xlu0 }
 0x2ad   : > { %3480 = vtanh.f32 %v2613_v14  ;;  %v2532_v29 = vpop.f32.mrf.mxu0 }
 0x2ae   : > { %v2372_v5 = vpop.f32.mrf.mxu3  ;;  %v2710_v45 = vadd.f32 %v4559_v4, %v2677_v62  ;;  %v2049_v6 = vpop.f32.mrf.mxu1 }
 0x2af   : > { %v2418_v57 = vadd.f32 %v2372_v5, %v2243_v34  ;;  %v2092_v22 = vadd.f32 %v2049_v6, %v4491_v46 }
 0x2b0   : > { %2758 = vxpose.xlu1.b32.cont [6/16] %v2710_v45, 128 }
 0x2b1   : > { %v2578_v51 = vadd.f32 %v2532_v29, %v2418_v57  ;;  %v2200_v21 = vpop.f32.mrf.mxu2 }
 0x2b2   : > { %v2244_v2 = vadd.f32 %v2200_v21, %v2091_v37 }
 0x2b3   : > { %v3481_v39 = vpop.eup %3480  ;;  %v2614_v15 = vadd.f32 %v4540_v49, %v2578_v51 }
 0x2b4   : > { %v2678_v27 = vmul.f32 %v3481_v39, %v4553_v10  ;;  %v4727_v59 = vpop.trf.xlu0 }
 0x2b5   : > { %3482 = vtanh.f32 %v2614_v15  ;;  %v2535_v53 = vpop.f32.mrf.mxu0 }
 0x2b6   : > { %v2375_v38 = vpop.f32.mrf.mxu3  ;;  %v2711_v25 = vadd.f32 %v4559_v4, %v2678_v27  ;;  %v2052_v55 = vpop.f32.mrf.mxu1 }
 0x2b7   : > { %v2419_v40 = vadd.f32 %v2375_v38, %v2244_v2  ;;  %v2093_v46 = vadd.f32 %v2052_v55, %v4500_v44 }
 0x2b8   : > { %2759 = vxpose.xlu1.b32.cont [7/16] %v2711_v25, 128 }
 0x2b9   : > { %v2579_v7 = vadd.f32 %v2535_v53, %v2419_v40  ;;  %v2202_v26 = vpop.f32.mrf.mxu2 }
 0x2ba   : > { %v2245_v48 = vadd.f32 %v2202_v26, %v2092_v22 }
 0x2bb   : > { %v3483_v42 = vpop.eup %3482  ;;  %v2615_v28 = vadd.f32 %v4540_v49, %v2579_v7 }
 0x2bc   : > { %v2679_v23 = vmul.f32 %v3483_v42, %v4553_v10  ;;  %v4733_v63 = vpop.trf.xlu0 }
 0x2bd   : > { %3484 = vtanh.f32 %v2615_v28  ;;  %v2537_v24 = vpop.f32.mrf.mxu0 }
 0x2be   : > { %v2377_v31 = vpop.f32.mrf.mxu3  ;;  %v2712_v3 = vadd.f32 %v4559_v4, %v2679_v23  ;;  %v2054_v56 = vpop.f32.mrf.mxu1 }
 0x2bf   : > { %v2420_v33 = vadd.f32 %v2377_v31, %v2245_v48  ;;  %v2094_v44 = vadd.f32 %v2054_v56, %v4505_v43 }
 0x2c0   : > { %2760 = vxpose.xlu1.b32.cont [8/16] %v2712_v3, 128 }
 0x2c1   : > { %v2580_v50 = vadd.f32 %v2537_v24, %v2420_v33  ;;  %v2205_v0 = vpop.f32.mrf.mxu2 }
 0x2c2   : > { %v2246_v8 = vadd.f32 %v2205_v0, %v2093_v46 }
 0x2c3   : > { %v3485_v20 = vpop.eup %3484  ;;  %v2616_v54 = vadd.f32 %v4540_v49, %v2580_v50 }
 0x2c4   : > { %v2680_v13 = vmul.f32 %v3485_v20, %v4553_v10  ;;  %v4739_v16 = vpop.trf.xlu0 }
 0x2c5   : > { %3486 = vtanh.f32 %v2616_v54  ;;  %v2540_v35 = vpop.f32.mrf.mxu0 }
 0x2c6   : > { %v2380_v30 = vpop.f32.mrf.mxu3  ;;  %v2713_v41 = vadd.f32 %v4559_v4, %v2680_v13  ;;  %v2057_v52 = vpop.f32.mrf.mxu1 }
 0x2c7   : > { %v2421_v11 = vadd.f32 %v2380_v30, %v2246_v8  ;;  %v2095_v43 = vadd.f32 %v2057_v52, %v4514_v60 }
 0x2c8   : > { %2761 = vxpose.xlu1.b32.cont [9/16] %v2713_v41, 128 }
 0x2c9   : > { %v2581_v58 = vadd.f32 %v2540_v35, %v2421_v11  ;;  %v2207_v12 = vpop.f32.mrf.mxu2 }
 0x2ca   : > { %v2247_v1 = vadd.f32 %v2207_v12, %v2094_v44 }
 0x2cb   : > { %v3487_v19 = vpop.eup %3486  ;;  %v2617_v47 = vadd.f32 %v4540_v49, %v2581_v58 }
 0x2cc   : > { %v2681_v36 = vmul.f32 %v3487_v19, %v4553_v10  ;;  %v4745_v6 = vpop.trf.xlu0 }
 0x2cd   : > { %3488 = vtanh.f32 %v2617_v47  ;;  %v2542_v18 = vpop.f32.mrf.mxu0 }
 0x2ce   : > { %v2382_v14 = vpop.f32.mrf.mxu3  ;;  %v2714_v34 = vadd.f32 %v4559_v4, %v2681_v36  ;;  %v2059_v29 = vpop.f32.mrf.mxu1 }
 0x2cf   : > { %v2422_v62 = vadd.f32 %v2382_v14, %v2247_v1  ;;  %v2096_v38 = vadd.f32 %v2059_v29, %v4519_v32 }
 0x2d0   : > { %2762 = vxpose.xlu1.b32.cont [10/16] %v2714_v34, 128 }
 0x2d1   : > { %v2582_v5 = vadd.f32 %v2542_v18, %v2422_v62  ;;  %v2210_v45 = vpop.f32.mrf.mxu2 }
 0x2d2   : > { %v2248_v37 = vadd.f32 %v2210_v45, %v2095_v43 }
 0x2d3   : > { %v3489_v57 = vpop.eup %3488  ;;  %v2618_v51 = vadd.f32 %v4540_v49, %v2582_v5 }
 0x2d4   : > { %v2682_v21 = vmul.f32 %v3489_v57, %v4553_v10  ;;  %v4751_v25 = vpop.trf.xlu0 }
 0x2d5   : > { %3490 = vtanh.f32 %v2618_v51  ;;  %v2545_v39 = vpop.f32.mrf.mxu0 }
 0x2d6   : > { %v2385_v15 = vpop.f32.mrf.mxu3  ;;  %v2715_v2 = vadd.f32 %v4559_v4, %v2682_v21  ;;  %v2062_v22 = vpop.f32.mrf.mxu1 }
 0x2d7   : > { %v2423_v27 = vadd.f32 %v2385_v15, %v2248_v37  ;;  %v2097_v32 = vadd.f32 %v2062_v22, %v4528_v17  ;;  %v2785_v37 = vld [vmem:[%s4777_s29] sm:$0xff]  ;;  %v2787_v15 = vld [vmem:[%s4777_s29 + $0x10] sm:$0xff] }
 0x2d8   : > { %2763 = vxpose.xlu1.b32.cont [11/16] %v2715_v2, 128  ;;  %v2793_v21 = vmul.f32 %v2785_v37, %v4745_v6  ;;  %v2795_v2 = vmul.f32 %v2787_v15, %v4751_v25  ;;  %v2791_v22 = vld [vmem:[%s4777_s29 + $0x30] sm:$0xff] }
 0x2d9   : > { %v2583_v53 = vadd.f32 %v2545_v39, %v2423_v27  ;;  %v2212_v60 = vpop.f32.mrf.mxu2 }
 0x2da   : > { %v2249_v7 = vadd.f32 %v2212_v60, %v2096_v38  ;;  %v2789_v38 = vld [vmem:[%s4777_s29 + $0x20] sm:$0xff] }
 0x2db   : > { %v3491_v55 = vpop.eup %3490  ;;  %v2619_v40 = vadd.f32 %v4540_v49, %v2583_v53 }
 0x2dc   : > { %v2683_v26 = vmul.f32 %v3491_v55, %v4553_v10  ;;  %v4757_v3 = vpop.trf.xlu0 }
 0x2dd   : > { %3492 = vtanh.f32 %v2619_v40  ;;  %v2547_v42 = vpop.f32.mrf.mxu0  ;;  %v2797_v25 = vmul.f32 %v2789_v38, %v4757_v3 }
 0x2de   : > { %v2387_v28 = vpop.f32.mrf.mxu3  ;;  %v2716_v48 = vadd.f32 %v4559_v4, %v2683_v26  ;;  %v2064_v0 = vpop.f32.mrf.mxu1 }
 0x2df   : > { %v2424_v23 = vadd.f32 %v2387_v28, %v2249_v7  ;;  %v2098_v17 = vadd.f32 %v2064_v0, %v4533_v61  ;;  %v3523_v61 = vld [vmem:[%s4831_s2] ss:$0 sm:$0xff] }
 0x2e0   : > { %2764 = vxpose.xlu1.b32.cont [12/16] %v2716_v48, 128 }
 0x2e1   : > { %v2584_v24 = vadd.f32 %v2547_v42, %v2424_v23  ;;  %v2215_v31 = vpop.f32.mrf.mxu2 }
 0x2e2   : > { %v2250_v50 = vadd.f32 %v2215_v31, %v2097_v32 }
 0x2e3   : > { %v3493_v56 = vpop.eup %3492  ;;  %v2620_v33 = vadd.f32 %v4540_v49, %v2584_v24 }
 0x2e4   : > { %v2684_v46 = vmul.f32 %v3493_v56, %v4553_v10  ;;  %v2744_v41 = vpop.trf.xlu0 }
 0x2e5   : > { %3494 = vtanh.f32 %v2620_v33  ;;  %v2550_v20 = vpop.f32.mrf.mxu0  ;;  %v2799_v42 = vmul.f32 %v2791_v22, %v2744_v41 }
 0x2e6   : > { %v2390_v54 = vpop.f32.mrf.mxu3  ;;  %v2717_v8 = vadd.f32 %v4559_v4, %v2684_v46 }
 0x2e7   : > { %v2425_v13 = vadd.f32 %v2390_v54, %v2250_v50 }
 0x2e8   : > { %2765 = vxpose.xlu1.b32.cont [13/16] %v2717_v8, 128 }
 0x2e9   : > { %v2585_v35 = vadd.f32 %v2550_v20, %v2425_v13  ;;  %v2217_v30 = vpop.f32.mrf.mxu2 }
 0x2ea   : > { %v2251_v58 = vadd.f32 %v2217_v30, %v2098_v17  ;;  %v2786_v17 = vld [vmem:[%s4777_s29 + $0x8] sm:$0xff] }
 0x2eb   : > { %v3495_v52 = vpop.eup %3494  ;;  %v2621_v11 = vadd.f32 %v4540_v49, %v2585_v35 }
 0x2ec   : > { %v2685_v44 = vmul.f32 %v3495_v52, %v4553_v10  ;;  %v2745_v18 = vpop.trf.xlu0 }
 0x2ed   : > { %3496 = vtanh.f32 %v2621_v11  ;;  %v2552_v1 = vpop.f32.mrf.mxu0 }
 0x2ee   : > { %v2392_v12 = vpop.f32.mrf.mxu3  ;;  %v2718_v19 = vadd.f32 %v4559_v4, %v2685_v44 }
 0x2ef   : > { %v2426_v47 = vadd.f32 %v2392_v12, %v2251_v58  ;;  %v2788_v58 = vld [vmem:[%s4777_s29 + $0x18] sm:$0xff] }
 0x2f0   : > { %2766 = vxpose.xlu1.b32.cont [14/16] %v2718_v19, 128 }
 0x2f1   : > { %v2586_v36 = vadd.f32 %v2552_v1, %v2426_v47 }
 0x2f3   : > { %v3497_v14 = vpop.eup %3496  ;;  %v2622_v34 = vadd.f32 %v3523_v61, %v2586_v36 }
 0x2f4   : > { %v2686_v49 = vmul.f32 %v3497_v14, %v4553_v10  ;;  %v2746_v29 = vpop.trf.xlu0 }
 0x2f5   : > { %3498 = vtanh.f32 %v2622_v34 }
 0x2f6   : > { %v2719_v62 = vadd.f32 %v4559_v4, %v2686_v49 }
 0x2f8   : > { %2767 = vxpose.xlu1.b32.cont [15/16] %v2719_v62, 128 }
 0x2fb   : > { %v3499_v5 = vpop.eup %3498 }
 0x2fc   : > { %v2687_v43 = vmul.f32 %v3499_v5, %v4553_v10  ;;  %v2747_v57 = vpop.trf.xlu0  ;;  %v2792_v5 = vld [vmem:[%s4777_s29 + $0x38] sm:$0xff] }
 0x2fe   : > { %v2720_v45 = vadd.f32 %v4559_v4, %v2687_v43 }
 0x300   : > { %2768 = vxpose.xlu1.b32.end [16/16] %v2720_v45, 128 }
 0x304   : > { %v2748_v51 = vpop.trf.xlu0 }
 0x30c   : > { %v2749_v39 = vpop.trf.xlu0 }
 0x30d   : > { %v2801_v10 = vmul.f32 %v2749_v39, %v4721_v9 }
 0x30f   : > { %v2809_v4 = vadd.f32 %v2801_v10, %v2793_v21 }
 0x311   : > { %3500 = vtanh.f32 %v2809_v4  ;;  %2833 = vst [vmem:[%s4785_s7] sm:$0xff] %v2809_v4 }
 0x314   : > { %v2750_v27 = vpop.trf.xlu0 }
 0x315   : > { %v2803_v6 = vmul.f32 %v2750_v27, %v4727_v59 }
 0x317   : > { %v3501_v53 = vpop.eup %3500  ;;  %v2811_v9 = vadd.f32 %v2803_v6, %v2795_v2 }
 0x318   : > { %v2825_v60 = vmul.f32 %v3501_v53, %v2745_v18  ;;  %v2790_v18 = vld [vmem:[%s4777_s29 + $0x28] sm:$0xff] }
 0x319   : > { %3502 = vtanh.f32 %v2811_v9  ;;  %2835 = vst [vmem:[%s4785_s7 + $0x10] sm:$0xff] %v2811_v9 }
 0x31a   : > { %2841 = vst [vmem:[%s4794_s9] sm:$0xff] %v2825_v60 }
 0x31c   : > { %v2751_v55 = vpop.trf.xlu0 }
 0x31d   : > { %v2805_v59 = vmul.f32 %v2751_v55, %v4733_v63 }
 0x31f   : > { %v3503_v40 = vpop.eup %3502  ;;  %v2813_v7 = vadd.f32 %v2805_v59, %v2797_v25 }
 0x320   : > { %v2827_v26 = vmul.f32 %v3503_v40, %v2746_v29 }
 0x321   : > { %3504 = vtanh.f32 %v2813_v7  ;;  %2837 = vst [vmem:[%s4785_s7 + $0x20] sm:$0xff] %v2813_v7 }
 0x322   : > { %2843 = vst [vmem:[%s4794_s9 + $0x10] sm:$0xff] %v2827_v26 }
 0x324   : > { %v2752_v28 = vpop.trf.xlu0 }
 0x325   : > { %v2807_v48 = vmul.f32 %v2752_v28, %v4739_v16 }
 0x327   : > { %v3505_v23 = vpop.eup %3504  ;;  %v2815_v32 = vadd.f32 %v2807_v48, %v2799_v42 }
 0x328   : > { %v2829_v31 = vmul.f32 %v3505_v23, %v2747_v57 }
 0x329   : > { %3506 = vtanh.f32 %v2815_v32  ;;  %2839 = vst [vmem:[%s4785_s7 + $0x30] sm:$0xff] %v2815_v32 }
 0x32a   : > { %2845 = vst [vmem:[%s4794_s9 + $0x20] sm:$0xff] %v2829_v31 }
 0x32c   : > { %v2769_v24 = vpop.trf.xlu1 }
 0x32f   : > { %v3507_v63 = vpop.eup %3506 }
 0x330   : > { %v2831_v56 = vmul.f32 %v3507_v63, %v2748_v51 }
 0x332   : > { %2847 = vst [vmem:[%s4794_s9 + $0x30] sm:$0xff] %v2831_v56 }
 0x334   : > { %v2770_v3 = vpop.trf.xlu1 }
 0x33c   : > { %v2771_v33 = vpop.trf.xlu1 }
 0x344   : > { %v2772_v50 = vpop.trf.xlu1 }
 0x34c   : > { %v2773_v46 = vpop.trf.xlu1 }
 0x34d   : > { %v2794_v41 = vmul.f32 %v2786_v17, %v2773_v46 }
 0x354   : > { %v2774_v0 = vpop.trf.xlu1 }
 0x355   : > { %v2796_v12 = vmul.f32 %v2788_v58, %v2774_v0 }
 0x35c   : > { %v2775_v20 = vpop.trf.xlu1 }
 0x35d   : > { %v2798_v61 = vmul.f32 %v2790_v18, %v2775_v20 }
 0x364   : > { %v2776_v16 = vpop.trf.xlu1 }
 0x365   : > { %v2800_v45 = vmul.f32 %v2792_v5, %v2776_v16 }
 0x36c   : > { %v2777_v54 = vpop.trf.xlu1 }
 0x374   : > { %v2778_v8 = vpop.trf.xlu1 }
 0x37c   : > { %v2779_v13 = vpop.trf.xlu1 }
 0x384   : > { %v2780_v35 = vpop.trf.xlu1 }
 0x38c   : > { %v2781_v30 = vpop.trf.xlu1 }
 0x38d   : > { %v2802_v52 = vmul.f32 %v2781_v30, %v2769_v24 }
 0x38f   : > { %v2810_v11 = vadd.f32 %v2802_v52, %v2794_v41 }
 0x391   : > { %3508 = vtanh.f32 %v2810_v11  ;;  %2834 = vst [vmem:[%s4785_s7 + $0x8] sm:$0xff] %v2810_v11 }
 0x394   : > { %v2782_v44 = vpop.trf.xlu1 }
 0x395   : > { %v2804_v19 = vmul.f32 %v2782_v44, %v2770_v3 }
 0x397   : > { %v3509_v47 = vpop.eup %3508  ;;  %v2812_v1 = vadd.f32 %v2804_v19, %v2796_v12 }
 0x398   : > { %v2826_v36 = vmul.f32 %v3509_v47, %v2777_v54 }
 0x399   : > { %3510 = vtanh.f32 %v2812_v1  ;;  %2836 = vst [vmem:[%s4785_s7 + $0x18] sm:$0xff] %v2812_v1 }
 0x39a   : > { %2842 = vst [vmem:[%s4794_s9 + $0x8] sm:$0xff] %v2826_v36 }
 0x39c   : > { %v2783_v14 = vpop.trf.xlu1 }
 0x39d   : > { %v2806_v34 = vmul.f32 %v2783_v14, %v2771_v33 }
 0x39f   : > { %v3511_v49 = vpop.eup %3510  ;;  %v2814_v62 = vadd.f32 %v2806_v34, %v2798_v61 }
 0x3a0   : > { %v2828_v29 = vmul.f32 %v3511_v49, %v2778_v8 }
 0x3a1   : > { %3512 = vtanh.f32 %v2814_v62  ;;  %2838 = vst [vmem:[%s4785_s7 + $0x28] sm:$0xff] %v2814_v62 }
 0x3a2   : > { %2844 = vst [vmem:[%s4794_s9 + $0x18] sm:$0xff] %v2828_v29 }
 0x3a4   : > { %v2784_v43 = vpop.trf.xlu1 }
 0x3a5   : > { %v2808_v57 = vmul.f32 %v2784_v43, %v2772_v50 }
 0x3a7   : > { %v3513_v51 = vpop.eup %3512  ;;  %v2816_v37 = vadd.f32 %v2808_v57, %v2800_v45 }
 0x3a8   : > { %v2830_v21 = vmul.f32 %v3513_v51, %v2779_v13 }
 0x3a9   : > { %3514 = vtanh.f32 %v2816_v37  ;;  %2840 = vst [vmem:[%s4785_s7 + $0x38] sm:$0xff] %v2816_v37 }
 0x3aa   : > { %2846 = vst [vmem:[%s4794_s9 + $0x28] sm:$0xff] %v2830_v21 }
 0x3af   : > { %v3515_v39 = vpop.eup %3514 }
 0x3b0   : > { %v2832_v10 = vmul.f32 %v3515_v39, %v2780_v35 }
 0x3b2   : > { %2848 = vst [vmem:[%s4794_s9 + $0x38] sm:$0xff] %v2832_v10 }
 0x3b3 PF: > { %s16_s20 = sadd.s32 1, %s3546_s20   ;;  %s4937_s18 = smov %s3542_s19 }
 0x3b4   : > { %p13_p5 = scmp.ge.s32.totalorder %s16_s20, 4   ;;  %s4938_s19 = smov %s4940_s21 }
 0x3b6   :  { %15 = sbr.rel (!%p13_p5) target bundleno = 2 (0x2), region = 90 }

</bundles_post_ra>
